<compile_context>
chip_gen: v7x
topology: tpu7x:2x2x1
jax: 0.10.0
libtpu: 0.0.40
codegen_flags: <defaults>
</compile_context>

<pallas_src>
import functools
import math

import jax
import jax.numpy as jnp
from jax.experimental import pallas as pl
from jax.experimental.pallas import tpu as pltpu


# ----------------------------- Pallas kernels ------------------------------

def conv_relu_pool_kernel(xe_ref, xo_ref, t_ref, b_ref, o_ref, *, hp, lh):
    """Fused 3x3 valid conv + bias + ReLU + 2x2/2 max-pool for ONE image.

    xe_ref/xo_ref: (1, hp+1, W*Cin) bf16 -- even / odd input rows.
    t_ref:         (3, W*Cin, 2*lh) bf16 -- per-dy block-Toeplitz conv weights,
                   output columns ordered [even-w | odd-w], lh = Wp*Cout each.
    b_ref:         (1, 2*lh) f32 -- bias tiled per output column.
    o_ref:         (1, hp, lh) bf16 -- pooled output, (h, w, c) with c minor.
    """
    f32 = jnp.float32
    t0 = t_ref[0]
    t1 = t_ref[1]
    t2 = t_ref[2]
    xe0 = xe_ref[0, 0:hp, :]        # input rows 0, 2, ..., 2hp-2
    xe1 = xe_ref[0, 1:hp + 1, :]    # input rows 2, 4, ..., 2hp
    xo0 = xo_ref[0, 0:hp, :]        # input rows 1, 3, ..., 2hp-1
    xo1 = xo_ref[0, 1:hp + 1, :]    # input rows 3, 5, ..., 2hp+1

    # conv output rows 2r (even) and 2r+1 (odd), r = 0..hp-1; f32 accumulation.
    acc_e = (jnp.dot(xe0, t0, preferred_element_type=f32) +
             jnp.dot(xo0, t1, preferred_element_type=f32) +
             jnp.dot(xe1, t2, preferred_element_type=f32))
    acc_o = (jnp.dot(xo0, t0, preferred_element_type=f32) +
             jnp.dot(xe1, t1, preferred_element_type=f32) +
             jnp.dot(xo1, t2, preferred_element_type=f32))

    # 2x pool over H, then bias + ReLU (monotone => commutes with max),
    # then 2x pool over W via the [even-w | odd-w] column halves.
    hm = jnp.maximum(acc_e, acc_o)
    hm = jnp.maximum(hm + b_ref[...], 0.0)
    pooled = jnp.maximum(hm[:, 0:lh], hm[:, lh:2 * lh])
    o_ref[0] = pooled.astype(o_ref.dtype)


def head_kernel(drop_p, scale, apply_dropout,
                x_ref, u_ref, w1_ref, b1_ref, w2_ref, b2_ref, o_ref):
    """fc1 + ReLU + dropout + fc2 + log_softmax for one block of batch rows."""
    f32 = jnp.float32
    x = x_ref[...].astype(f32)
    h = jnp.dot(x, w1_ref[...], preferred_element_type=f32) + b1_ref[...]
    h = jnp.maximum(h, 0.0)
    if apply_dropout:
        keep = u_ref[...] >= drop_p              # drop with probability p
        h = jnp.where(keep, h * scale, 0.0)      # scale kept units by 1/(1-p)
    logits = jnp.dot(h, w2_ref[...], preferred_element_type=f32) + b2_ref[...]
    m = jnp.max(logits, axis=-1, keepdims=True)
    lse = jnp.log(jnp.sum(jnp.exp(logits - m), axis=-1, keepdims=True)) + m
    o_ref[...] = logits - lse


# ------------------------------ wrappers ------------------------------------

def conv_relu_pool_stage(x2d, t, b2):
    """One fused conv3x3+ReLU+pool2 stage.  x2d: (N, H, W*Cin) bf16."""
    n, h, wc = x2d.shape
    hp = (h - 2) // 2              # pooled output height
    l2 = t.shape[2]
    lh = l2 // 2                   # = Wp * Cout
    xe = x2d[:, 0:2 * hp + 1:2, :]     # even rows 0..2hp    -> (n, hp+1, wc)
    xo = x2d[:, 1:2 * hp + 2:2, :]     # odd rows  1..2hp+1  -> (n, hp+1, wc)
    kern = functools.partial(conv_relu_pool_kernel, hp=hp, lh=lh)
    return pl.pallas_call(
        kern,
        out_shape=jax.ShapeDtypeStruct((n, hp, lh), jnp.bfloat16),
        grid=(n,),
        in_specs=[
            pl.BlockSpec((1, hp + 1, wc), lambda i: (i, 0, 0)),
            pl.BlockSpec((1, hp + 1, wc), lambda i: (i, 0, 0)),
            pl.BlockSpec((3, wc, l2), lambda i: (0, 0, 0)),
            pl.BlockSpec((1, l2), lambda i: (0, 0)),
        ],
        out_specs=pl.BlockSpec((1, hp, lh), lambda i: (i, 0, 0)),
        compiler_params=pltpu.CompilerParams(
            dimension_semantics=("parallel",)),
    )(xe, xo, t, b2)


def classifier_head(flat, u, w1, b1, w2, b2, dropout_rate, training):
    n, f = flat.shape
    nf1 = w1.shape[1]
    c = w2.shape[1]
    tile_n = n if n <= 256 else 256        # row-block: VMEM bounded at any batch
    apply_dropout = bool(training) and float(dropout_rate) > 0.0
    scale = 1.0 / (1.0 - float(dropout_rate)) if apply_dropout else 1.0
    kern = functools.partial(head_kernel, float(dropout_rate), scale,
                             apply_dropout)
    return pl.pallas_call(
        kern,
        out_shape=jax.ShapeDtypeStruct((n, c), jnp.float32),
        grid=(pl.cdiv(n, tile_n),),
        in_specs=[
            pl.BlockSpec((tile_n, f), lambda i: (i, 0)),
            pl.BlockSpec((tile_n, nf1), lambda i: (i, 0)),
            pl.BlockSpec((f, nf1), lambda i: (0, 0)),
            pl.BlockSpec((1, nf1), lambda i: (0, 0)),
            pl.BlockSpec((nf1, c), lambda i: (0, 0)),
            pl.BlockSpec((1, c), lambda i: (0, 0)),
        ],
        out_specs=pl.BlockSpec((tile_n, c), lambda i: (i, 0)),
        compiler_params=pltpu.CompilerParams(
            dimension_semantics=("parallel",)),
    )(flat, u, w1, b1, w2, b2)


# ------------------------- one-time weight preparation -----------------------

def _build_toeplitz(conv_w, width):
    """Per-dy block-Toeplitz matrices for a 3x3 valid conv over rows of width
    `width`.  Output columns are permuted to [even-w | odd-w] blocks so the 2x
    w-pooling becomes a contiguous lane slice inside the kernel.

    conv_w: (3, 3, Cin, Cout).  Returns (3, width*Cin, 2*Wp*Cout) f32.
    """
    kh, kw, cin, cout = conv_w.shape
    wo = width - kw + 1
    wp = wo // 2
    wo_used = 2 * wp                      # floor-pool drops the last odd column
    t = jnp.zeros((kh, width, cin, wo_used, cout), jnp.float32)
    for dx in range(kw):
        # sel[wi, wo] = 1  iff  wi == wo + dx
        sel = jnp.eye(width, wo_used, k=-dx, dtype=jnp.float32)
        t = t + jnp.einsum("av,dco->dacvo", sel,
                           conv_w[:, dx].astype(jnp.float32))
    perm = jnp.array(list(range(0, wo_used, 2)) + list(range(1, wo_used, 2)),
                     jnp.int32)
    t = t[:, :, :, perm, :]
    return t.reshape(kh, width * cin, wo_used * cout)


def prepare_params(params, h_in, w_in):
    """One-time (per weight update) prep on tiny weight tensors: bf16 Toeplitz
    conv weights, tiled f32 biases, and fc1 rows permuted from PyTorch (C,H,W)
    flatten order to our (H,W,C) order.  Pure array pytree (jit-friendly)."""
    stages = []
    h, w = h_in, w_in
    for i in range(1, 5):
        cw = params[f"conv{i}_w"]                   # (3, 3, cin, cout)
        cb = params[f"conv{i}_b"]                   # (cout,)
        hp, wp = (h - 2) // 2, (w - 2) // 2
        t = _build_toeplitz(cw, w).astype(jnp.bfloat16)
        b2 = jnp.tile(cb.astype(jnp.float32), 2 * wp).reshape(1, -1)
        stages.append({"t": t, "b": b2})
        h, w = hp, wp
    cout4 = params["conv4_w"].shape[3]
    nf1 = params["fc1_w"].shape[1]
    fc1_w = params["fc1_w"].reshape(cout4, h, w, nf1)       # PyTorch (c,h,w) rows
    fc1_w = fc1_w.transpose(1, 2, 0, 3).reshape(-1, nf1)    # -> our (h,w,c) rows
    return {
        "stages": stages,
        "fc1_w": fc1_w.astype(jnp.float32),
        "fc1_b": params["fc1_b"].reshape(1, -1).astype(jnp.float32),
        "fc2_w": params["fc2_w"].astype(jnp.float32),
        "fc2_b": params["fc2_b"].reshape(1, -1).astype(jnp.float32),
    }


# ------------------------------- forward pass --------------------------------

def net_forward(x_nchw, prep, rng_key, *, dropout_rate, training=True):
    """Forward of Net: 4x(conv3x3+ReLU+maxpool2) -> fc1 -> ReLU -> dropout ->
    fc2 -> log_softmax."""
    n = x_nchw.shape[0]
    x = jnp.transpose(x_nchw, (0, 2, 3, 1))                    # NCHW -> NHWC
    x2d = x.reshape(n, x.shape[1], -1).astype(jnp.bfloat16)    # (N, H, W*C)
    for st in prep["stages"]:
        x2d = conv_relu_pool_stage(x2d, st["t"], st["b"])
    flat = x2d.reshape(n, -1)                  # (N, Hp*Wp*Cout) in (h,w,c) order
    nf1 = prep["fc1_w"].shape[1]
    u = jax.random.uniform(rng_key, (n, nf1), jnp.float32)     # dropout randoms
    return classifier_head(flat, u, prep["fc1_w"], prep["fc1_b"],
                           prep["fc2_w"], prep["fc2_b"], dropout_rate, training)


# --------------------------- parameter creation ------------------------------

def init_params(key, c_in, h_in, w_in, init_f, num_fc1, num_classes):
    def uinit(k, shape, fan_in):
        bound = 1.0 / math.sqrt(fan_in)
        return jax.random.uniform(k, shape, jnp.float32, -bound, bound)

    params = {}
    chans = [c_in, init_f, 2 * init_f, 4 * init_f, 8 * init_f]
    h, w = h_in, w_in
    keys = jax.random.split(key, 12)
    ki = 0
    for i in range(1, 5):
        cin, cout = chans[i - 1], chans[i]
        fan_in = cin * 9
        params[f"conv{i}_w"] = uinit(keys[ki], (3, 3, cin, cout), fan_in); ki += 1
        params[f"conv{i}_b"] = uinit(keys[ki], (cout,), fan_in); ki += 1
        h, w = (h - 2) // 2, (w - 2) // 2          # conv3x3 (valid) + pool2
    num_flatten = h * w * 8 * init_f
    params["fc1_w"] = uinit(keys[ki], (num_flatten, num_fc1), num_flatten); ki += 1
    params["fc1_b"] = uinit(keys[ki], (num_fc1,), num_flatten); ki += 1
    params["fc2_w"] = uinit(keys[ki], (num_fc1, num_classes), num_fc1); ki += 1
    params["fc2_b"] = uinit(keys[ki], (num_classes,), num_fc1); ki += 1
    return params, num_flatten


# ---------------------------------- main -------------------------------------

if __name__ == "__main__":
    # config analogous to the PyTorch module's params dict
    C_in, H_in, W_in = 3, 64, 64
    init_f, num_fc1, num_classes = 4, 32, 2
    dropout_rate = 0.25
    batch = 2

    key = jax.random.PRNGKey(0)
    kx, kp, kd = jax.random.split(key, 3)
    x = jax.random.normal(kx, (batch, C_in, H_in, W_in), jnp.float32)
    params, num_flatten = init_params(kp, C_in, H_in, W_in,
                                      init_f, num_fc1, num_classes)
    prep = prepare_params(params, H_in, W_in)
    assert prep["fc1_w"].shape[0] == num_flatten

    fwd = jax.jit(net_forward, static_argnames=("dropout_rate", "training"))
    out = fwd(x, prep, kd, dropout_rate=dropout_rate, training=True)
    out = jax.block_until_ready(out)

    assert out.shape == (batch, num_classes)
    # log_softmax sanity: rows exponentiate-and-sum to 1
    assert bool(jnp.all(jnp.abs(jnp.exp(out).sum(axis=1) - 1.0) < 1e-4))
    print("KERNEL_OK")
</pallas_src>

<mosaic_0001>
module attributes {stable_mosaic.version = 11 : i64} {
  func.func @conv_relu_pool_kernel(%arg0: i32, %arg1: memref<1x32x192xbf16, #tpu.memory_space<vmem>>, %arg2: memref<1x32x192xbf16, #tpu.memory_space<vmem>>, %arg3: memref<3x192x248xbf16, #tpu.memory_space<vmem>>, %arg4: memref<1x248xf32, #tpu.memory_space<vmem>>, %arg5: memref<1x31x124xbf16, #tpu.memory_space<vmem>>) attributes {dimension_semantics = [#tpu.dimension_semantics<parallel>], iteration_bounds = array<i64: 2>, scalar_prefetch = 0 : i64, scratch_operands = 0 : i64, tpu.core_type = #tpu.core_type<tc>, window_params = [{transform_indices = @transform_0, window_bounds = array<i64: 1, 32, 192>}, {transform_indices = @transform_1, window_bounds = array<i64: 1, 32, 192>}, {pipeline_mode = #tpu.pipeline_mode<synchronous>, transform_indices = @transform_2, window_bounds = array<i64: 3, 192, 248>}, {pipeline_mode = #tpu.pipeline_mode<synchronous>, transform_indices = @transform_3, window_bounds = array<i64: 1, 248>}, {transform_indices = @transform_4, window_bounds = array<i64: 1, 31, 124>}]} {
    %c0 = arith.constant 0 : index
    %c0_0 = arith.constant 0 : index
    %c0_1 = arith.constant 0 : index
    %0 = vector.load %arg3[%c0, %c0_0, %c0_1] : memref<3x192x248xbf16, #tpu.memory_space<vmem>>, vector<1x192x248xbf16>
    %1 = vector.shape_cast %0 : vector<1x192x248xbf16> to vector<192x248xbf16>
    %c1 = arith.constant 1 : index
    %c0_2 = arith.constant 0 : index
    %c0_3 = arith.constant 0 : index
    %2 = vector.load %arg3[%c1, %c0_2, %c0_3] : memref<3x192x248xbf16, #tpu.memory_space<vmem>>, vector<1x192x248xbf16>
    %3 = vector.shape_cast %2 : vector<1x192x248xbf16> to vector<192x248xbf16>
    %c2 = arith.constant 2 : index
    %c0_4 = arith.constant 0 : index
    %c0_5 = arith.constant 0 : index
    %4 = vector.load %arg3[%c2, %c0_4, %c0_5] : memref<3x192x248xbf16, #tpu.memory_space<vmem>>, vector<1x192x248xbf16>
    %5 = vector.shape_cast %4 : vector<1x192x248xbf16> to vector<192x248xbf16>
    %c0_6 = arith.constant 0 : index
    %c0_7 = arith.constant 0 : index
    %c0_8 = arith.constant 0 : index
    %6 = vector.load %arg1[%c0_6, %c0_7, %c0_8] : memref<1x32x192xbf16, #tpu.memory_space<vmem>>, vector<1x31x192xbf16>
    %7 = vector.shape_cast %6 : vector<1x31x192xbf16> to vector<31x192xbf16>
    %c0_9 = arith.constant 0 : index
    %c1_10 = arith.constant 1 : index
    %c0_11 = arith.constant 0 : index
    %8 = vector.load %arg1[%c0_9, %c1_10, %c0_11] : memref<1x32x192xbf16, #tpu.memory_space<vmem>>, vector<1x31x192xbf16>
    %9 = vector.shape_cast %8 : vector<1x31x192xbf16> to vector<31x192xbf16>
    %c0_12 = arith.constant 0 : index
    %c0_13 = arith.constant 0 : index
    %c0_14 = arith.constant 0 : index
    %10 = vector.load %arg2[%c0_12, %c0_13, %c0_14] : memref<1x32x192xbf16, #tpu.memory_space<vmem>>, vector<1x31x192xbf16>
    %11 = vector.shape_cast %10 : vector<1x31x192xbf16> to vector<31x192xbf16>
    %c0_15 = arith.constant 0 : index
    %c1_16 = arith.constant 1 : index
    %c0_17 = arith.constant 0 : index
    %12 = vector.load %arg2[%c0_15, %c1_16, %c0_17] : memref<1x32x192xbf16, #tpu.memory_space<vmem>>, vector<1x31x192xbf16>
    %13 = vector.shape_cast %12 : vector<1x31x192xbf16> to vector<31x192xbf16>
    %cst = arith.constant dense<0.000000e+00> : vector<31x248xf32>
    %14 = tpu.matmul %7, %1, %cst {dimension_numbers = #tpu.dot_dimension_numbers<[1], [0], [0], [1], [0, 0, 1, 1], [], []>} : vector<31x192xbf16>, vector<192x248xbf16>, vector<31x248xf32> -> vector<31x248xf32>
    %cst_18 = arith.constant dense<0.000000e+00> : vector<31x248xf32>
    %15 = tpu.matmul %11, %3, %cst_18 {dimension_numbers = #tpu.dot_dimension_numbers<[1], [0], [0], [1], [0, 0, 1, 1], [], []>} : vector<31x192xbf16>, vector<192x248xbf16>, vector<31x248xf32> -> vector<31x248xf32>
    %16 = arith.addf %14, %15 : vector<31x248xf32>
    %cst_19 = arith.constant dense<0.000000e+00> : vector<31x248xf32>
    %17 = tpu.matmul %9, %5, %cst_19 {dimension_numbers = #tpu.dot_dimension_numbers<[1], [0], [0], [1], [0, 0, 1, 1], [], []>} : vector<31x192xbf16>, vector<192x248xbf16>, vector<31x248xf32> -> vector<31x248xf32>
    %18 = arith.addf %16, %17 : vector<31x248xf32>
    %cst_20 = arith.constant dense<0.000000e+00> : vector<31x248xf32>
    %19 = tpu.matmul %11, %1, %cst_20 {dimension_numbers = #tpu.dot_dimension_numbers<[1], [0], [0], [1], [0, 0, 1, 1], [], []>} : vector<31x192xbf16>, vector<192x248xbf16>, vector<31x248xf32> -> vector<31x248xf32>
    %cst_21 = arith.constant dense<0.000000e+00> : vector<31x248xf32>
    %20 = tpu.matmul %9, %3, %cst_21 {dimension_numbers = #tpu.dot_dimension_numbers<[1], [0], [0], [1], [0, 0, 1, 1], [], []>} : vector<31x192xbf16>, vector<192x248xbf16>, vector<31x248xf32> -> vector<31x248xf32>
    %21 = arith.addf %19, %20 : vector<31x248xf32>
    %cst_22 = arith.constant dense<0.000000e+00> : vector<31x248xf32>
    %22 = tpu.matmul %13, %5, %cst_22 {dimension_numbers = #tpu.dot_dimension_numbers<[1], [0], [0], [1], [0, 0, 1, 1], [], []>} : vector<31x192xbf16>, vector<192x248xbf16>, vector<31x248xf32> -> vector<31x248xf32>
    %23 = arith.addf %21, %22 : vector<31x248xf32>
    %24 = arith.maximumf %18, %23 : vector<31x248xf32>
    %c0_23 = arith.constant 0 : index
    %c0_24 = arith.constant 0 : index
    %25 = vector.load %arg4[%c0_23, %c0_24] : memref<1x248xf32, #tpu.memory_space<vmem>>, vector<1x248xf32>
    %26 = vector.broadcast %25 : vector<1x248xf32> to vector<31x248xf32>
    %27 = arith.addf %24, %26 : vector<31x248xf32>
    %cst_25 = arith.constant 0.000000e+00 : f32
    %28 = vector.broadcast %cst_25 : f32 to vector<31x248xf32>
    %29 = arith.maximumf %27, %28 : vector<31x248xf32>
    %30 = vector.extract_strided_slice %29 {offsets = [0, 0], sizes = [31, 124], strides = [1, 1]} : vector<31x248xf32> to vector<31x124xf32>
    %31 = vector.extract_strided_slice %29 {offsets = [0, 124], sizes = [31, 124], strides = [1, 1]} : vector<31x248xf32> to vector<31x124xf32>
    %32 = arith.maximumf %30, %31 : vector<31x124xf32>
    %33 = arith.truncf %32 : vector<31x124xf32> to vector<31x124xbf16>
    %c0_26 = arith.constant 0 : index
    %c0_27 = arith.constant 0 : index
    %c0_28 = arith.constant 0 : index
    %34 = vector.load %arg5[%c0_26, %c0_27, %c0_28] : memref<1x31x124xbf16, #tpu.memory_space<vmem>>, vector<1x31x124xbf16>
    %35 = vector.shape_cast %34 : vector<1x31x124xbf16> to vector<31x124xbf16>
    %36 = vector.shape_cast %33 : vector<31x124xbf16> to vector<1x31x124xbf16>
    tpu.vector_store %arg5[%c0_26, %c0_27, %c0_28], %36 {strides = array<i32>} : memref<1x31x124xbf16, #tpu.memory_space<vmem>>, vector<1x31x124xbf16>,
    return
  }
  func.func @transform_0(%arg0: i32) -> (i32, i32, i32) {
    %c0_i32 = arith.constant 0 : i32
    %c0_i32_0 = arith.constant 0 : i32
    %c0_i32_1 = arith.constant 0 : i32
    return %arg0, %c0_i32, %c0_i32_0 : i32, i32, i32
  }
  func.func @transform_1(%arg0: i32) -> (i32, i32, i32) {
    %c0_i32 = arith.constant 0 : i32
    %c0_i32_0 = arith.constant 0 : i32
    %c0_i32_1 = arith.constant 0 : i32
    return %arg0, %c0_i32, %c0_i32_0 : i32, i32, i32
  }
  func.func @transform_2(%arg0: i32) -> (i32, i32, i32) {
    %c0_i32 = arith.constant 0 : i32
    %c0_i32_0 = arith.constant 0 : i32
    %c0_i32_1 = arith.constant 0 : i32
    %c0_i32_2 = arith.constant 0 : i32
    return %c0_i32, %c0_i32_0, %c0_i32_1 : i32, i32, i32
  }
  func.func @transform_3(%arg0: i32) -> (i32, i32) {
    %c0_i32 = arith.constant 0 : i32
    %c0_i32_0 = arith.constant 0 : i32
    %c0_i32_1 = arith.constant 0 : i32
    return %c0_i32, %c0_i32_0 : i32, i32
  }
  func.func @transform_4(%arg0: i32) -> (i32, i32, i32) {
    %c0_i32 = arith.constant 0 : i32
    %c0_i32_0 = arith.constant 0 : i32
    %c0_i32_1 = arith.constant 0 : i32
    return %arg0, %c0_i32, %c0_i32_0 : i32, i32, i32
  }
}

module attributes {stable_mosaic.version = 11 : i64} {
  func.func @conv_relu_pool_kernel(%arg0: i32, %arg1: memref<1x15x124xbf16, #tpu.memory_space<vmem>>, %arg2: memref<1x15x124xbf16, #tpu.memory_space<vmem>>, %arg3: memref<3x124x224xbf16, #tpu.memory_space<vmem>>, %arg4: memref<1x224xf32, #tpu.memory_space<vmem>>, %arg5: memref<1x14x112xbf16, #tpu.memory_space<vmem>>) attributes {dimension_semantics = [#tpu.dimension_semantics<parallel>], iteration_bounds = array<i64: 2>, scalar_prefetch = 0 : i64, scratch_operands = 0 : i64, tpu.core_type = #tpu.core_type<tc>, window_params = [{transform_indices = @transform_0, window_bounds = array<i64: 1, 15, 124>}, {transform_indices = @transform_1, window_bounds = array<i64: 1, 15, 124>}, {pipeline_mode = #tpu.pipeline_mode<synchronous>, transform_indices = @transform_2, window_bounds = array<i64: 3, 124, 224>}, {pipeline_mode = #tpu.pipeline_mode<synchronous>, transform_indices = @transform_3, window_bounds = array<i64: 1, 224>}, {transform_indices = @transform_4, window_bounds = array<i64: 1, 14, 112>}]} {
    %c0 = arith.constant 0 : index
    %c0_0 = arith.constant 0 : index
    %c0_1 = arith.constant 0 : index
    %0 = vector.load %arg3[%c0, %c0_0, %c0_1] : memref<3x124x224xbf16, #tpu.memory_space<vmem>>, vector<1x124x224xbf16>
    %1 = vector.shape_cast %0 : vector<1x124x224xbf16> to vector<124x224xbf16>
    %c1 = arith.constant 1 : index
    %c0_2 = arith.constant 0 : index
    %c0_3 = arith.constant 0 : index
    %2 = vector.load %arg3[%c1, %c0_2, %c0_3] : memref<3x124x224xbf16, #tpu.memory_space<vmem>>, vector<1x124x224xbf16>
    %3 = vector.shape_cast %2 : vector<1x124x224xbf16> to vector<124x224xbf16>
    %c2 = arith.constant 2 : index
    %c0_4 = arith.constant 0 : index
    %c0_5 = arith.constant 0 : index
    %4 = vector.load %arg3[%c2, %c0_4, %c0_5] : memref<3x124x224xbf16, #tpu.memory_space<vmem>>, vector<1x124x224xbf16>
    %5 = vector.shape_cast %4 : vector<1x124x224xbf16> to vector<124x224xbf16>
    %c0_6 = arith.constant 0 : index
    %c0_7 = arith.constant 0 : index
    %c0_8 = arith.constant 0 : index
    %6 = vector.load %arg1[%c0_6, %c0_7, %c0_8] : memref<1x15x124xbf16, #tpu.memory_space<vmem>>, vector<1x14x124xbf16>
    %7 = vector.shape_cast %6 : vector<1x14x124xbf16> to vector<14x124xbf16>
    %c0_9 = arith.constant 0 : index
    %c1_10 = arith.constant 1 : index
    %c0_11 = arith.constant 0 : index
    %8 = vector.load %arg1[%c0_9, %c1_10, %c0_11] : memref<1x15x124xbf16, #tpu.memory_space<vmem>>, vector<1x14x124xbf16>
    %9 = vector.shape_cast %8 : vector<1x14x124xbf16> to vector<14x124xbf16>
    %c0_12 = arith.constant 0 : index
    %c0_13 = arith.constant 0 : index
    %c0_14 = arith.constant 0 : index
    %10 = vector.load %arg2[%c0_12, %c0_13, %c0_14] : memref<1x15x124xbf16, #tpu.memory_space<vmem>>, vector<1x14x124xbf16>
    %11 = vector.shape_cast %10 : vector<1x14x124xbf16> to vector<14x124xbf16>
    %c0_15 = arith.constant 0 : index
    %c1_16 = arith.constant 1 : index
    %c0_17 = arith.constant 0 : index
    %12 = vector.load %arg2[%c0_15, %c1_16, %c0_17] : memref<1x15x124xbf16, #tpu.memory_space<vmem>>, vector<1x14x124xbf16>
    %13 = vector.shape_cast %12 : vector<1x14x124xbf16> to vector<14x124xbf16>
    %cst = arith.constant dense<0.000000e+00> : vector<14x224xf32>
    %14 = tpu.matmul %7, %1, %cst {dimension_numbers = #tpu.dot_dimension_numbers<[1], [0], [0], [1], [0, 0, 1, 1], [], []>} : vector<14x124xbf16>, vector<124x224xbf16>, vector<14x224xf32> -> vector<14x224xf32>
    %cst_18 = arith.constant dense<0.000000e+00> : vector<14x224xf32>
    %15 = tpu.matmul %11, %3, %cst_18 {dimension_numbers = #tpu.dot_dimension_numbers<[1], [0], [0], [1], [0, 0, 1, 1], [], []>} : vector<14x124xbf16>, vector<124x224xbf16>, vector<14x224xf32> -> vector<14x224xf32>
    %16 = arith.addf %14, %15 : vector<14x224xf32>
    %cst_19 = arith.constant dense<0.000000e+00> : vector<14x224xf32>
    %17 = tpu.matmul %9, %5, %cst_19 {dimension_numbers = #tpu.dot_dimension_numbers<[1], [0], [0], [1], [0, 0, 1, 1], [], []>} : vector<14x124xbf16>, vector<124x224xbf16>, vector<14x224xf32> -> vector<14x224xf32>
    %18 = arith.addf %16, %17 : vector<14x224xf32>
    %cst_20 = arith.constant dense<0.000000e+00> : vector<14x224xf32>
    %19 = tpu.matmul %11, %1, %cst_20 {dimension_numbers = #tpu.dot_dimension_numbers<[1], [0], [0], [1], [0, 0, 1, 1], [], []>} : vector<14x124xbf16>, vector<124x224xbf16>, vector<14x224xf32> -> vector<14x224xf32>
    %cst_21 = arith.constant dense<0.000000e+00> : vector<14x224xf32>
    %20 = tpu.matmul %9, %3, %cst_21 {dimension_numbers = #tpu.dot_dimension_numbers<[1], [0], [0], [1], [0, 0, 1, 1], [], []>} : vector<14x124xbf16>, vector<124x224xbf16>, vector<14x224xf32> -> vector<14x224xf32>
    %21 = arith.addf %19, %20 : vector<14x224xf32>
    %cst_22 = arith.constant dense<0.000000e+00> : vector<14x224xf32>
    %22 = tpu.matmul %13, %5, %cst_22 {dimension_numbers = #tpu.dot_dimension_numbers<[1], [0], [0], [1], [0, 0, 1, 1], [], []>} : vector<14x124xbf16>, vector<124x224xbf16>, vector<14x224xf32> -> vector<14x224xf32>
    %23 = arith.addf %21, %22 : vector<14x224xf32>
    %24 = arith.maximumf %18, %23 : vector<14x224xf32>
    %c0_23 = arith.constant 0 : index
    %c0_24 = arith.constant 0 : index
    %25 = vector.load %arg4[%c0_23, %c0_24] : memref<1x224xf32, #tpu.memory_space<vmem>>, vector<1x224xf32>
    %26 = vector.broadcast %25 : vector<1x224xf32> to vector<14x224xf32>
    %27 = arith.addf %24, %26 : vector<14x224xf32>
    %cst_25 = arith.constant 0.000000e+00 : f32
    %28 = vector.broadcast %cst_25 : f32 to vector<14x224xf32>
    %29 = arith.maximumf %27, %28 : vector<14x224xf32>
    %30 = vector.extract_strided_slice %29 {offsets = [0, 0], sizes = [14, 112], strides = [1, 1]} : vector<14x224xf32> to vector<14x112xf32>
    %31 = vector.extract_strided_slice %29 {offsets = [0, 112], sizes = [14, 112], strides = [1, 1]} : vector<14x224xf32> to vector<14x112xf32>
    %32 = arith.maximumf %30, %31 : vector<14x112xf32>
    %33 = arith.truncf %32 : vector<14x112xf32> to vector<14x112xbf16>
    %c0_26 = arith.constant 0 : index
    %c0_27 = arith.constant 0 : index
    %c0_28 = arith.constant 0 : index
    %34 = vector.load %arg5[%c0_26, %c0_27, %c0_28] : memref<1x14x112xbf16, #tpu.memory_space<vmem>>, vector<1x14x112xbf16>
    %35 = vector.shape_cast %34 : vector<1x14x112xbf16> to vector<14x112xbf16>
    %36 = vector.shape_cast %33 : vector<14x112xbf16> to vector<1x14x112xbf16>
    tpu.vector_store %arg5[%c0_26, %c0_27, %c0_28], %36 {strides = array<i32>} : memref<1x14x112xbf16, #tpu.memory_space<vmem>>, vector<1x14x112xbf16>,
    return
  }
  func.func @transform_0(%arg0: i32) -> (i32, i32, i32) {
    %c0_i32 = arith.constant 0 : i32
    %c0_i32_0 = arith.constant 0 : i32
    %c0_i32_1 = arith.constant 0 : i32
    return %arg0, %c0_i32, %c0_i32_0 : i32, i32, i32
  }
  func.func @transform_1(%arg0: i32) -> (i32, i32, i32) {
    %c0_i32 = arith.constant 0 : i32
    %c0_i32_0 = arith.constant 0 : i32
    %c0_i32_1 = arith.constant 0 : i32
    return %arg0, %c0_i32, %c0_i32_0 : i32, i32, i32
  }
  func.func @transform_2(%arg0: i32) -> (i32, i32, i32) {
    %c0_i32 = arith.constant 0 : i32
    %c0_i32_0 = arith.constant 0 : i32
    %c0_i32_1 = arith.constant 0 : i32
    %c0_i32_2 = arith.constant 0 : i32
    return %c0_i32, %c0_i32_0, %c0_i32_1 : i32, i32, i32
  }
  func.func @transform_3(%arg0: i32) -> (i32, i32) {
    %c0_i32 = arith.constant 0 : i32
    %c0_i32_0 = arith.constant 0 : i32
    %c0_i32_1 = arith.constant 0 : i32
    return %c0_i32, %c0_i32_0 : i32, i32
  }
  func.func @transform_4(%arg0: i32) -> (i32, i32, i32) {
    %c0_i32 = arith.constant 0 : i32
    %c0_i32_0 = arith.constant 0 : i32
    %c0_i32_1 = arith.constant 0 : i32
    return %arg0, %c0_i32, %c0_i32_0 : i32, i32, i32
  }
}

module attributes {stable_mosaic.version = 11 : i64} {
  func.func @conv_relu_pool_kernel(%arg0: i32, %arg1: memref<1x7x112xbf16, #tpu.memory_space<vmem>>, %arg2: memref<1x7x112xbf16, #tpu.memory_space<vmem>>, %arg3: memref<3x112x192xbf16, #tpu.memory_space<vmem>>, %arg4: memref<1x192xf32, #tpu.memory_space<vmem>>, %arg5: memref<1x6x96xbf16, #tpu.memory_space<vmem>>) attributes {dimension_semantics = [#tpu.dimension_semantics<parallel>], iteration_bounds = array<i64: 2>, scalar_prefetch = 0 : i64, scratch_operands = 0 : i64, tpu.core_type = #tpu.core_type<tc>, window_params = [{transform_indices = @transform_0, window_bounds = array<i64: 1, 7, 112>}, {transform_indices = @transform_1, window_bounds = array<i64: 1, 7, 112>}, {pipeline_mode = #tpu.pipeline_mode<synchronous>, transform_indices = @transform_2, window_bounds = array<i64: 3, 112, 192>}, {pipeline_mode = #tpu.pipeline_mode<synchronous>, transform_indices = @transform_3, window_bounds = array<i64: 1, 192>}, {transform_indices = @transform_4, window_bounds = array<i64: 1, 6, 96>}]} {
    %c0 = arith.constant 0 : index
    %c0_0 = arith.constant 0 : index
    %c0_1 = arith.constant 0 : index
    %0 = vector.load %arg3[%c0, %c0_0, %c0_1] : memref<3x112x192xbf16, #tpu.memory_space<vmem>>, vector<1x112x192xbf16>
    %1 = vector.shape_cast %0 : vector<1x112x192xbf16> to vector<112x192xbf16>
    %c1 = arith.constant 1 : index
    %c0_2 = arith.constant 0 : index
    %c0_3 = arith.constant 0 : index
    %2 = vector.load %arg3[%c1, %c0_2, %c0_3] : memref<3x112x192xbf16, #tpu.memory_space<vmem>>, vector<1x112x192xbf16>
    %3 = vector.shape_cast %2 : vector<1x112x192xbf16> to vector<112x192xbf16>
    %c2 = arith.constant 2 : index
    %c0_4 = arith.constant 0 : index
    %c0_5 = arith.constant 0 : index
    %4 = vector.load %arg3[%c2, %c0_4, %c0_5] : memref<3x112x192xbf16, #tpu.memory_space<vmem>>, vector<1x112x192xbf16>
    %5 = vector.shape_cast %4 : vector<1x112x192xbf16> to vector<112x192xbf16>
    %c0_6 = arith.constant 0 : index
    %c0_7 = arith.constant 0 : index
    %c0_8 = arith.constant 0 : index
    %6 = vector.load %arg1[%c0_6, %c0_7, %c0_8] : memref<1x7x112xbf16, #tpu.memory_space<vmem>>, vector<1x6x112xbf16>
    %7 = vector.shape_cast %6 : vector<1x6x112xbf16> to vector<6x112xbf16>
    %c0_9 = arith.constant 0 : index
    %c1_10 = arith.constant 1 : index
    %c0_11 = arith.constant 0 : index
    %8 = vector.load %arg1[%c0_9, %c1_10, %c0_11] : memref<1x7x112xbf16, #tpu.memory_space<vmem>>, vector<1x6x112xbf16>
    %9 = vector.shape_cast %8 : vector<1x6x112xbf16> to vector<6x112xbf16>
    %c0_12 = arith.constant 0 : index
    %c0_13 = arith.constant 0 : index
    %c0_14 = arith.constant 0 : index
    %10 = vector.load %arg2[%c0_12, %c0_13, %c0_14] : memref<1x7x112xbf16, #tpu.memory_space<vmem>>, vector<1x6x112xbf16>
    %11 = vector.shape_cast %10 : vector<1x6x112xbf16> to vector<6x112xbf16>
    %c0_15 = arith.constant 0 : index
    %c1_16 = arith.constant 1 : index
    %c0_17 = arith.constant 0 : index
    %12 = vector.load %arg2[%c0_15, %c1_16, %c0_17] : memref<1x7x112xbf16, #tpu.memory_space<vmem>>, vector<1x6x112xbf16>
    %13 = vector.shape_cast %12 : vector<1x6x112xbf16> to vector<6x112xbf16>
    %cst = arith.constant dense<0.000000e+00> : vector<6x192xf32>
    %14 = tpu.matmul %7, %1, %cst {dimension_numbers = #tpu.dot_dimension_numbers<[1], [0], [0], [1], [0, 0, 1, 1], [], []>} : vector<6x112xbf16>, vector<112x192xbf16>, vector<6x192xf32> -> vector<6x192xf32>
    %cst_18 = arith.constant dense<0.000000e+00> : vector<6x192xf32>
    %15 = tpu.matmul %11, %3, %cst_18 {dimension_numbers = #tpu.dot_dimension_numbers<[1], [0], [0], [1], [0, 0, 1, 1], [], []>} : vector<6x112xbf16>, vector<112x192xbf16>, vector<6x192xf32> -> vector<6x192xf32>
    %16 = arith.addf %14, %15 : vector<6x192xf32>
    %cst_19 = arith.constant dense<0.000000e+00> : vector<6x192xf32>
    %17 = tpu.matmul %9, %5, %cst_19 {dimension_numbers = #tpu.dot_dimension_numbers<[1], [0], [0], [1], [0, 0, 1, 1], [], []>} : vector<6x112xbf16>, vector<112x192xbf16>, vector<6x192xf32> -> vector<6x192xf32>
    %18 = arith.addf %16, %17 : vector<6x192xf32>
    %cst_20 = arith.constant dense<0.000000e+00> : vector<6x192xf32>
    %19 = tpu.matmul %11, %1, %cst_20 {dimension_numbers = #tpu.dot_dimension_numbers<[1], [0], [0], [1], [0, 0, 1, 1], [], []>} : vector<6x112xbf16>, vector<112x192xbf16>, vector<6x192xf32> -> vector<6x192xf32>
    %cst_21 = arith.constant dense<0.000000e+00> : vector<6x192xf32>
    %20 = tpu.matmul %9, %3, %cst_21 {dimension_numbers = #tpu.dot_dimension_numbers<[1], [0], [0], [1], [0, 0, 1, 1], [], []>} : vector<6x112xbf16>, vector<112x192xbf16>, vector<6x192xf32> -> vector<6x192xf32>
    %21 = arith.addf %19, %20 : vector<6x192xf32>
    %cst_22 = arith.constant dense<0.000000e+00> : vector<6x192xf32>
    %22 = tpu.matmul %13, %5, %cst_22 {dimension_numbers = #tpu.dot_dimension_numbers<[1], [0], [0], [1], [0, 0, 1, 1], [], []>} : vector<6x112xbf16>, vector<112x192xbf16>, vector<6x192xf32> -> vector<6x192xf32>
    %23 = arith.addf %21, %22 : vector<6x192xf32>
    %24 = arith.maximumf %18, %23 : vector<6x192xf32>
    %c0_23 = arith.constant 0 : index
    %c0_24 = arith.constant 0 : index
    %25 = vector.load %arg4[%c0_23, %c0_24] : memref<1x192xf32, #tpu.memory_space<vmem>>, vector<1x192xf32>
    %26 = vector.broadcast %25 : vector<1x192xf32> to vector<6x192xf32>
    %27 = arith.addf %24, %26 : vector<6x192xf32>
    %cst_25 = arith.constant 0.000000e+00 : f32
    %28 = vector.broadcast %cst_25 : f32 to vector<6x192xf32>
    %29 = arith.maximumf %27, %28 : vector<6x192xf32>
    %30 = vector.extract_strided_slice %29 {offsets = [0, 0], sizes = [6, 96], strides = [1, 1]} : vector<6x192xf32> to vector<6x96xf32>
    %31 = vector.extract_strided_slice %29 {offsets = [0, 96], sizes = [6, 96], strides = [1, 1]} : vector<6x192xf32> to vector<6x96xf32>
    %32 = arith.maximumf %30, %31 : vector<6x96xf32>
    %33 = arith.truncf %32 : vector<6x96xf32> to vector<6x96xbf16>
    %c0_26 = arith.constant 0 : index
    %c0_27 = arith.constant 0 : index
    %c0_28 = arith.constant 0 : index
    %34 = vector.load %arg5[%c0_26, %c0_27, %c0_28] : memref<1x6x96xbf16, #tpu.memory_space<vmem>>, vector<1x6x96xbf16>
    %35 = vector.shape_cast %34 : vector<1x6x96xbf16> to vector<6x96xbf16>
    %36 = vector.shape_cast %33 : vector<6x96xbf16> to vector<1x6x96xbf16>
    tpu.vector_store %arg5[%c0_26, %c0_27, %c0_28], %36 {strides = array<i32>} : memref<1x6x96xbf16, #tpu.memory_space<vmem>>, vector<1x6x96xbf16>,
    return
  }
  func.func @transform_0(%arg0: i32) -> (i32, i32, i32) {
    %c0_i32 = arith.constant 0 : i32
    %c0_i32_0 = arith.constant 0 : i32
    %c0_i32_1 = arith.constant 0 : i32
    return %arg0, %c0_i32, %c0_i32_0 : i32, i32, i32
  }
  func.func @transform_1(%arg0: i32) -> (i32, i32, i32) {
    %c0_i32 = arith.constant 0 : i32
    %c0_i32_0 = arith.constant 0 : i32
    %c0_i32_1 = arith.constant 0 : i32
    return %arg0, %c0_i32, %c0_i32_0 : i32, i32, i32
  }
  func.func @transform_2(%arg0: i32) -> (i32, i32, i32) {
    %c0_i32 = arith.constant 0 : i32
    %c0_i32_0 = arith.constant 0 : i32
    %c0_i32_1 = arith.constant 0 : i32
    %c0_i32_2 = arith.constant 0 : i32
    return %c0_i32, %c0_i32_0, %c0_i32_1 : i32, i32, i32
  }
  func.func @transform_3(%arg0: i32) -> (i32, i32) {
    %c0_i32 = arith.constant 0 : i32
    %c0_i32_0 = arith.constant 0 : i32
    %c0_i32_1 = arith.constant 0 : i32
    return %c0_i32, %c0_i32_0 : i32, i32
  }
  func.func @transform_4(%arg0: i32) -> (i32, i32, i32) {
    %c0_i32 = arith.constant 0 : i32
    %c0_i32_0 = arith.constant 0 : i32
    %c0_i32_1 = arith.constant 0 : i32
    return %arg0, %c0_i32, %c0_i32_0 : i32, i32, i32
  }
}

module attributes {stable_mosaic.version = 11 : i64} {
  func.func @conv_relu_pool_kernel(%arg0: i32, %arg1: memref<1x3x96xbf16, #tpu.memory_space<vmem>>, %arg2: memref<1x3x96xbf16, #tpu.memory_space<vmem>>, %arg3: memref<3x96x128xbf16, #tpu.memory_space<vmem>>, %arg4: memref<1x128xf32, #tpu.memory_space<vmem>>, %arg5: memref<1x2x64xbf16, #tpu.memory_space<vmem>>) attributes {dimension_semantics = [#tpu.dimension_semantics<parallel>], iteration_bounds = array<i64: 2>, scalar_prefetch = 0 : i64, scratch_operands = 0 : i64, tpu.core_type = #tpu.core_type<tc>, window_params = [{transform_indices = @transform_0, window_bounds = array<i64: 1, 3, 96>}, {transform_indices = @transform_1, window_bounds = array<i64: 1, 3, 96>}, {pipeline_mode = #tpu.pipeline_mode<synchronous>, transform_indices = @transform_2, window_bounds = array<i64: 3, 96, 128>}, {pipeline_mode = #tpu.pipeline_mode<synchronous>, transform_indices = @transform_3, window_bounds = array<i64: 1, 128>}, {transform_indices = @transform_4, window_bounds = array<i64: 1, 2, 64>}]} {
    %c0 = arith.constant 0 : index
    %c0_0 = arith.constant 0 : index
    %c0_1 = arith.constant 0 : index
    %0 = vector.load %arg3[%c0, %c0_0, %c0_1] : memref<3x96x128xbf16, #tpu.memory_space<vmem>>, vector<1x96x128xbf16>
    %1 = vector.shape_cast %0 : vector<1x96x128xbf16> to vector<96x128xbf16>
    %c1 = arith.constant 1 : index
    %c0_2 = arith.constant 0 : index
    %c0_3 = arith.constant 0 : index
    %2 = vector.load %arg3[%c1, %c0_2, %c0_3] : memref<3x96x128xbf16, #tpu.memory_space<vmem>>, vector<1x96x128xbf16>
    %3 = vector.shape_cast %2 : vector<1x96x128xbf16> to vector<96x128xbf16>
    %c2 = arith.constant 2 : index
    %c0_4 = arith.constant 0 : index
    %c0_5 = arith.constant 0 : index
    %4 = vector.load %arg3[%c2, %c0_4, %c0_5] : memref<3x96x128xbf16, #tpu.memory_space<vmem>>, vector<1x96x128xbf16>
    %5 = vector.shape_cast %4 : vector<1x96x128xbf16> to vector<96x128xbf16>
    %c0_6 = arith.constant 0 : index
    %c0_7 = arith.constant 0 : index
    %c0_8 = arith.constant 0 : index
    %6 = vector.load %arg1[%c0_6, %c0_7, %c0_8] : memref<1x3x96xbf16, #tpu.memory_space<vmem>>, vector<1x2x96xbf16>
    %7 = vector.shape_cast %6 : vector<1x2x96xbf16> to vector<2x96xbf16>
    %c0_9 = arith.constant 0 : index
    %c1_10 = arith.constant 1 : index
    %c0_11 = arith.constant 0 : index
    %8 = vector.load %arg1[%c0_9, %c1_10, %c0_11] : memref<1x3x96xbf16, #tpu.memory_space<vmem>>, vector<1x2x96xbf16>
    %9 = vector.shape_cast %8 : vector<1x2x96xbf16> to vector<2x96xbf16>
    %c0_12 = arith.constant 0 : index
    %c0_13 = arith.constant 0 : index
    %c0_14 = arith.constant 0 : index
    %10 = vector.load %arg2[%c0_12, %c0_13, %c0_14] : memref<1x3x96xbf16, #tpu.memory_space<vmem>>, vector<1x2x96xbf16>
    %11 = vector.shape_cast %10 : vector<1x2x96xbf16> to vector<2x96xbf16>
    %c0_15 = arith.constant 0 : index
    %c1_16 = arith.constant 1 : index
    %c0_17 = arith.constant 0 : index
    %12 = vector.load %arg2[%c0_15, %c1_16, %c0_17] : memref<1x3x96xbf16, #tpu.memory_space<vmem>>, vector<1x2x96xbf16>
    %13 = vector.shape_cast %12 : vector<1x2x96xbf16> to vector<2x96xbf16>
    %cst = arith.constant dense<0.000000e+00> : vector<2x128xf32>
    %14 = tpu.matmul %7, %1, %cst {dimension_numbers = #tpu.dot_dimension_numbers<[1], [0], [0], [1], [0, 0, 1, 1], [], []>} : vector<2x96xbf16>, vector<96x128xbf16>, vector<2x128xf32> -> vector<2x128xf32>
    %cst_18 = arith.constant dense<0.000000e+00> : vector<2x128xf32>
    %15 = tpu.matmul %11, %3, %cst_18 {dimension_numbers = #tpu.dot_dimension_numbers<[1], [0], [0], [1], [0, 0, 1, 1], [], []>} : vector<2x96xbf16>, vector<96x128xbf16>, vector<2x128xf32> -> vector<2x128xf32>
    %16 = arith.addf %14, %15 : vector<2x128xf32>
    %cst_19 = arith.constant dense<0.000000e+00> : vector<2x128xf32>
    %17 = tpu.matmul %9, %5, %cst_19 {dimension_numbers = #tpu.dot_dimension_numbers<[1], [0], [0], [1], [0, 0, 1, 1], [], []>} : vector<2x96xbf16>, vector<96x128xbf16>, vector<2x128xf32> -> vector<2x128xf32>
    %18 = arith.addf %16, %17 : vector<2x128xf32>
    %cst_20 = arith.constant dense<0.000000e+00> : vector<2x128xf32>
    %19 = tpu.matmul %11, %1, %cst_20 {dimension_numbers = #tpu.dot_dimension_numbers<[1], [0], [0], [1], [0, 0, 1, 1], [], []>} : vector<2x96xbf16>, vector<96x128xbf16>, vector<2x128xf32> -> vector<2x128xf32>
    %cst_21 = arith.constant dense<0.000000e+00> : vector<2x128xf32>
    %20 = tpu.matmul %9, %3, %cst_21 {dimension_numbers = #tpu.dot_dimension_numbers<[1], [0], [0], [1], [0, 0, 1, 1], [], []>} : vector<2x96xbf16>, vector<96x128xbf16>, vector<2x128xf32> -> vector<2x128xf32>
    %21 = arith.addf %19, %20 : vector<2x128xf32>
    %cst_22 = arith.constant dense<0.000000e+00> : vector<2x128xf32>
    %22 = tpu.matmul %13, %5, %cst_22 {dimension_numbers = #tpu.dot_dimension_numbers<[1], [0], [0], [1], [0, 0, 1, 1], [], []>} : vector<2x96xbf16>, vector<96x128xbf16>, vector<2x128xf32> -> vector<2x128xf32>
    %23 = arith.addf %21, %22 : vector<2x128xf32>
    %24 = arith.maximumf %18, %23 : vector<2x128xf32>
    %c0_23 = arith.constant 0 : index
    %c0_24 = arith.constant 0 : index
    %25 = vector.load %arg4[%c0_23, %c0_24] : memref<1x128xf32, #tpu.memory_space<vmem>>, vector<1x128xf32>
    %26 = vector.broadcast %25 : vector<1x128xf32> to vector<2x128xf32>
    %27 = arith.addf %24, %26 : vector<2x128xf32>
    %cst_25 = arith.constant 0.000000e+00 : f32
    %28 = vector.broadcast %cst_25 : f32 to vector<2x128xf32>
    %29 = arith.maximumf %27, %28 : vector<2x128xf32>
    %30 = vector.extract_strided_slice %29 {offsets = [0, 0], sizes = [2, 64], strides = [1, 1]} : vector<2x128xf32> to vector<2x64xf32>
    %31 = vector.extract_strided_slice %29 {offsets = [0, 64], sizes = [2, 64], strides = [1, 1]} : vector<2x128xf32> to vector<2x64xf32>
    %32 = arith.maximumf %30, %31 : vector<2x64xf32>
    %33 = arith.truncf %32 : vector<2x64xf32> to vector<2x64xbf16>
    %c0_26 = arith.constant 0 : index
    %c0_27 = arith.constant 0 : index
    %c0_28 = arith.constant 0 : index
    %34 = vector.load %arg5[%c0_26, %c0_27, %c0_28] : memref<1x2x64xbf16, #tpu.memory_space<vmem>>, vector<1x2x64xbf16>
    %35 = vector.shape_cast %34 : vector<1x2x64xbf16> to vector<2x64xbf16>
    %36 = vector.shape_cast %33 : vector<2x64xbf16> to vector<1x2x64xbf16>
    tpu.vector_store %arg5[%c0_26, %c0_27, %c0_28], %36 {strides = array<i32>} : memref<1x2x64xbf16, #tpu.memory_space<vmem>>, vector<1x2x64xbf16>,
    return
  }
  func.func @transform_0(%arg0: i32) -> (i32, i32, i32) {
    %c0_i32 = arith.constant 0 : i32
    %c0_i32_0 = arith.constant 0 : i32
    %c0_i32_1 = arith.constant 0 : i32
    return %arg0, %c0_i32, %c0_i32_0 : i32, i32, i32
  }
  func.func @transform_1(%arg0: i32) -> (i32, i32, i32) {
    %c0_i32 = arith.constant 0 : i32
    %c0_i32_0 = arith.constant 0 : i32
    %c0_i32_1 = arith.constant 0 : i32
    return %arg0, %c0_i32, %c0_i32_0 : i32, i32, i32
  }
  func.func @transform_2(%arg0: i32) -> (i32, i32, i32) {
    %c0_i32 = arith.constant 0 : i32
    %c0_i32_0 = arith.constant 0 : i32
    %c0_i32_1 = arith.constant 0 : i32
    %c0_i32_2 = arith.constant 0 : i32
    return %c0_i32, %c0_i32_0, %c0_i32_1 : i32, i32, i32
  }
  func.func @transform_3(%arg0: i32) -> (i32, i32) {
    %c0_i32 = arith.constant 0 : i32
    %c0_i32_0 = arith.constant 0 : i32
    %c0_i32_1 = arith.constant 0 : i32
    return %c0_i32, %c0_i32_0 : i32, i32
  }
  func.func @transform_4(%arg0: i32) -> (i32, i32, i32) {
    %c0_i32 = arith.constant 0 : i32
    %c0_i32_0 = arith.constant 0 : i32
    %c0_i32_1 = arith.constant 0 : i32
    return %arg0, %c0_i32, %c0_i32_0 : i32, i32, i32
  }
}

module attributes {stable_mosaic.version = 11 : i64} {
  func.func @head_kernel(%arg0: i32, %arg1: memref<2x128xbf16, #tpu.memory_space<vmem>>, %arg2: memref<2x32xf32, #tpu.memory_space<vmem>>, %arg3: memref<128x32xf32, #tpu.memory_space<vmem>>, %arg4: memref<1x32xf32, #tpu.memory_space<vmem>>, %arg5: memref<32x2xf32, #tpu.memory_space<vmem>>, %arg6: memref<1x2xf32, #tpu.memory_space<vmem>>, %arg7: memref<2x2xf32, #tpu.memory_space<vmem>>) attributes {dimension_semantics = [#tpu.dimension_semantics<parallel>], iteration_bounds = array<i64: 1>, scalar_prefetch = 0 : i64, scratch_operands = 0 : i64, tpu.core_type = #tpu.core_type<tc>, window_params = [{transform_indices = @transform_0, window_bounds = array<i64: 2, 128>}, {transform_indices = @transform_1, window_bounds = array<i64: 2, 32>}, {pipeline_mode = #tpu.pipeline_mode<synchronous>, transform_indices = @transform_2, window_bounds = array<i64: 128, 32>}, {pipeline_mode = #tpu.pipeline_mode<synchronous>, transform_indices = @transform_3, window_bounds = array<i64: 1, 32>}, {pipeline_mode = #tpu.pipeline_mode<synchronous>, transform_indices = @transform_4, window_bounds = array<i64: 32, 2>}, {pipeline_mode = #tpu.pipeline_mode<synchronous>, transform_indices = @transform_5, window_bounds = array<i64: 1, 2>}, {transform_indices = @transform_6, window_bounds = array<i64: 2, 2>}]} {
    %c0 = arith.constant 0 : index
    %c0_0 = arith.constant 0 : index
    %0 = vector.load %arg1[%c0, %c0_0] : memref<2x128xbf16, #tpu.memory_space<vmem>>, vector<2x128xbf16>
    %1 = arith.extf %0 : vector<2x128xbf16> to vector<2x128xf32>
    %c0_1 = arith.constant 0 : index
    %c0_2 = arith.constant 0 : index
    %2 = vector.load %arg3[%c0_1, %c0_2] : memref<128x32xf32, #tpu.memory_space<vmem>>, vector<128x32xf32>
    %cst = arith.constant dense<0.000000e+00> : vector<2x32xf32>
    %3 = tpu.matmul %1, %2, %cst {dimension_numbers = #tpu.dot_dimension_numbers<[1], [0], [0], [1], [0, 0, 1, 1], [], []>} : vector<2x128xf32>, vector<128x32xf32>, vector<2x32xf32> -> vector<2x32xf32>
    %c0_3 = arith.constant 0 : index
    %c0_4 = arith.constant 0 : index
    %4 = vector.load %arg4[%c0_3, %c0_4] : memref<1x32xf32, #tpu.memory_space<vmem>>, vector<1x32xf32>
    %5 = vector.broadcast %4 : vector<1x32xf32> to vector<2x32xf32>
    %6 = arith.addf %3, %5 : vector<2x32xf32>
    %cst_5 = arith.constant 0.000000e+00 : f32
    %7 = vector.broadcast %cst_5 : f32 to vector<2x32xf32>
    %8 = arith.maximumf %6, %7 : vector<2x32xf32>
    %c0_6 = arith.constant 0 : index
    %c0_7 = arith.constant 0 : index
    %9 = vector.load %arg2[%c0_6, %c0_7] : memref<2x32xf32, #tpu.memory_space<vmem>>, vector<2x32xf32>
    %cst_8 = arith.constant 2.500000e-01 : f32
    %10 = vector.broadcast %cst_8 : f32 to vector<2x32xf32>
    %11 = arith.cmpf oge, %9, %10 : vector<2x32xf32>
    %cst_9 = arith.constant 1.33333337 : f32
    %12 = vector.broadcast %cst_9 : f32 to vector<2x32xf32>
    %13 = arith.mulf %8, %12 : vector<2x32xf32>
    %cst_10 = arith.constant 0.000000e+00 : f32
    %14 = vector.broadcast %cst_10 : f32 to vector<2x32xf32>
    %15 = arith.select %11, %13, %14 : vector<2x32xi1>, vector<2x32xf32>
    %c0_11 = arith.constant 0 : index
    %c0_12 = arith.constant 0 : index
    %16 = vector.load %arg5[%c0_11, %c0_12] : memref<32x2xf32, #tpu.memory_space<vmem>>, vector<32x2xf32>
    %cst_13 = arith.constant dense<0.000000e+00> : vector<2x2xf32>
    %17 = tpu.matmul %15, %16, %cst_13 {dimension_numbers = #tpu.dot_dimension_numbers<[1], [0], [0], [1], [0, 0, 1, 1], [], []>} : vector<2x32xf32>, vector<32x2xf32>, vector<2x2xf32> -> vector<2x2xf32>
    %c0_14 = arith.constant 0 : index
    %c0_15 = arith.constant 0 : index
    %18 = vector.load %arg6[%c0_14, %c0_15] : memref<1x2xf32, #tpu.memory_space<vmem>>, vector<1x2xf32>
    %19 = vector.broadcast %18 : vector<1x2xf32> to vector<2x2xf32>
    %20 = arith.addf %17, %19 : vector<2x2xf32>
    %cst_16 = arith.constant dense<0xFF800000> : vector<2xf32>
    %21 = vector.multi_reduction <maximumf>, %20, %cst_16 [1] : vector<2x2xf32> to vector<2xf32>
    %22 = vector.shape_cast %21 : vector<2xf32> to vector<2x1xf32>
    %23 = vector.broadcast %22 : vector<2x1xf32> to vector<2x2xf32>
    %24 = arith.subf %20, %23 : vector<2x2xf32>
    %25 = math.exp %24 : vector<2x2xf32>
    %cst_17 = arith.constant dense<0.000000e+00> : vector<2xf32>
    %26 = vector.multi_reduction <add>, %25, %cst_17 [1] : vector<2x2xf32> to vector<2xf32>
    %27 = vector.shape_cast %26 : vector<2xf32> to vector<2x1xf32>
    %28 = math.log %27 : vector<2x1xf32>
    %29 = arith.addf %28, %22 : vector<2x1xf32>
    %30 = vector.broadcast %29 : vector<2x1xf32> to vector<2x2xf32>
    %31 = arith.subf %20, %30 : vector<2x2xf32>
    %c0_18 = arith.constant 0 : index
    %c0_19 = arith.constant 0 : index
    %32 = vector.load %arg7[%c0_18, %c0_19] : memref<2x2xf32, #tpu.memory_space<vmem>>, vector<2x2xf32>
    tpu.vector_store %arg7[%c0_18, %c0_19], %31 {strides = array<i32>} : memref<2x2xf32, #tpu.memory_space<vmem>>, vector<2x2xf32>,
    return
  }
  func.func @transform_0(%arg0: i32) -> (i32, i32) {
    %c0_i32 = arith.constant 0 : i32
    %c0_i32_0 = arith.constant 0 : i32
    return %arg0, %c0_i32 : i32, i32
  }
  func.func @transform_1(%arg0: i32) -> (i32, i32) {
    %c0_i32 = arith.constant 0 : i32
    %c0_i32_0 = arith.constant 0 : i32
    return %arg0, %c0_i32 : i32, i32
  }
  func.func @transform_2(%arg0: i32) -> (i32, i32) {
    %c0_i32 = arith.constant 0 : i32
    %c0_i32_0 = arith.constant 0 : i32
    %c0_i32_1 = arith.constant 0 : i32
    return %c0_i32, %c0_i32_0 : i32, i32
  }
  func.func @transform_3(%arg0: i32) -> (i32, i32) {
    %c0_i32 = arith.constant 0 : i32
    %c0_i32_0 = arith.constant 0 : i32
    %c0_i32_1 = arith.constant 0 : i32
    return %c0_i32, %c0_i32_0 : i32, i32
  }
  func.func @transform_4(%arg0: i32) -> (i32, i32) {
    %c0_i32 = arith.constant 0 : i32
    %c0_i32_0 = arith.constant 0 : i32
    %c0_i32_1 = arith.constant 0 : i32
    return %c0_i32, %c0_i32_0 : i32, i32
  }
  func.func @transform_5(%arg0: i32) -> (i32, i32) {
    %c0_i32 = arith.constant 0 : i32
    %c0_i32_0 = arith.constant 0 : i32
    %c0_i32_1 = arith.constant 0 : i32
    return %c0_i32, %c0_i32_0 : i32, i32
  }
  func.func @transform_6(%arg0: i32) -> (i32, i32) {
    %c0_i32 = arith.constant 0 : i32
    %c0_i32_0 = arith.constant 0 : i32
    return %arg0, %c0_i32 : i32, i32
  }
}

</mosaic_0001>

<bundles_post_ra>
// kernel: net_forward.5
= control target key start
LH: loop header
LB: loop body
LE: loop exit
PB: predicated region body
PF: predicated region fallthrough
CT: control target
= control target key end

     0   :  { %s1662_s15 = smov 0   ;;  %s2008_s0 = inlined_call_operand.vmem [shape: bf16[2,32,192], index: 0, kind: input, shape index: {}]   ;;  %s2009_s1 = inlined_call_operand.vmem [shape: bf16[2,32,192], index: 1, kind: input, shape index: {}]   ;;  %s2010_s2 = inlined_call_operand.vmem [shape: bf16[3,192,248], index: 2, kind: input, shape index: {}]   ;;  %s2011_s3 = inlined_call_operand.vmem [shape: f32[1,248], index: 3, kind: input, shape index: {}]   ;;  %s2012_s4 = inlined_call_operand.vmem [shape: bf16[2,31,124], index: 4, kind: output, shape index: {}]  }
   0x1 LB: > { %s1283_s16 = sadd.s32 4294967295, %s1634_s15   ;;  %p1287_p0 = scmp.ge.s32.totalorder %s1634_s15, 1  ;;  %s1634_s15 = sphi %s1662_s15, %s14_s15  }
   0x2   : > { %p172_p1 = scmp.lt.s32.totalorder %s1634_s15, 3 }
   0x4   : > { %p173_p2 = pnand %p1287_p0, %p172_p1 }
   0x5   : > { %v1508_v0 = vld [vmem:[%s2010_s2 + $0xc4] ss:$8 sps:$4 sm:$0xff] (!%p173_p2)   ;;  %v1510_v1 = vld [vmem:[%s2010_s2 + $0xc0] ss:$8 sps:$4 sm:$0xff] (!%p173_p2)   ;;  %v1511_v2 = vld [vmem:[%s2010_s2 + $0xd4] ss:$8 sps:$4 sm:$0xff] (!%p173_p2)  }
   0x6   : > { %176 = sbr.rel (%p173_p2) target bundleno = 508 (0x1fc), region = 36  ;;  %446 = vmatprep.subr.bf16.mxu0 (!%p173_p2), %v1508_v0  ;;  %914 = vmatprep.subr.bf16.mxu1 (!%p173_p2), %v1508_v0  ;;  %v1513_v3 = vld [vmem:[%s2010_s2 + $0xd0] ss:$8 sps:$4 sm:$0xff] (!%p173_p2)   ;;  %v1514_v4 = vld [vmem:[%s2010_s2 + $0xe4] ss:$8 sps:$4 sm:$0xff] (!%p173_p2)   ;;  %p203_p3 = scmp.lt.s32.totalorder (!%p173_p2), %s1283_s16, 1 }
   0x7   : > { %447 = vmatpush1.bf16.msra.mxu0 (!%p173_p2), %v1510_v1  ;;  %915 = vmatpush1.bf16.msra.mxu1 (!%p173_p2), %v1510_v1  ;;  %v1516_v5 = vld [vmem:[%s2010_s2 + $0xe0] ss:$8 sps:$4 sm:$0xff] (!%p173_p2)   ;;  %v1517_v6 = vld [vmem:[%s2010_s2 + $0xf4] ss:$8 sps:$4 sm:$0xff] (!%p173_p2)   ;;  %v1519_v7 = vld [vmem:[%s2010_s2 + $0xf0] ss:$8 sps:$4 sm:$0xff] (!%p173_p2)  }
   0x8   : > { %448 = vmatprep.subr.bf16.mxu0 (!%p173_p2), %v1511_v2  ;;  %916 = vmatprep.subr.bf16.mxu1 (!%p173_p2), %v1511_v2  ;;  %v1520_v8 = vld [vmem:[%s2010_s2 + $0x104] ss:$8 sps:$4 sm:$0xff] (!%p173_p2)   ;;  %v1522_v9 = vld [vmem:[%s2010_s2 + $0x100] ss:$8 sps:$4 sm:$0xff] (!%p173_p2)   ;;  %v1523_v10 = vld [vmem:[%s2010_s2 + $0x114] ss:$8 sps:$4 sm:$0xff] (!%p173_p2)  }
   0x9   : > { %vm439_vm0 = vcmask (!%p173_p2), 523264   ;;  %v1525_v12 = vld [vmem:[%s2010_s2 + $0x110] ss:$8 sps:$4 sm:$0xff] (!%p173_p2)   ;;  %v1526_v14 = vld [vmem:[%s2010_s2 + $0x124] ss:$8 sps:$4 sm:$0xff] (!%p173_p2)   ;;  %s1636_s27 = smov (!%p173_p2), 4  }
   0xa   : > { %v1528_v19 = vld [vmem:[%s2010_s2 + $0x120] ss:$8 sps:$4 sm:$0xff] (!%p173_p2)   ;;  %v1529_v21 = vld [vmem:[%s2010_s2 + $0x134] ss:$8 sps:$4 sm:$0xff] (!%p173_p2)   ;;  %vm696_vm1 = vsmask.f32 (!%p173_p2), 7424 }
   0xb   : > { %449 = vmatpush1.bf16.msra.mxu0 (!%p173_p2), %v1513_v3  ;;  %917 = vmatpush1.bf16.msra.mxu1 (!%p173_p2), %v1513_v3  ;;  %v1531_v24 = vld [vmem:[%s2010_s2 + $0x130] ss:$8 sps:$4 sm:$0xff] (!%p173_p2)   ;;  %v1532_v26 = vld [vmem:[%s2010_s2 + $0x144] ss:$8 sps:$4 sm:$0xff] (!%p173_p2)   ;;  %v1534_v28 = vld [vmem:[%s2010_s2 + $0x140] ss:$8 sps:$4 sm:$0xff] (!%p173_p2)  }
   0xc   : > { %450 = vmatprep.subr.bf16.mxu0 (!%p173_p2), %v1514_v4  ;;  %918 = vmatprep.subr.bf16.mxu1 (!%p173_p2), %v1514_v4  ;;  %v1535_v30 = vld [vmem:[%s2010_s2 + $0x154] ss:$8 sps:$4 sm:$0xff] (!%p173_p2)   ;;  %v1537_v31 = vld [vmem:[%s2010_s2 + $0x150] ss:$8 sps:$4 sm:$0xff] (!%p173_p2)   ;;  %v1538_v37 = vld [vmem:[%s2010_s2 + $0x164] ss:$8 sps:$4 sm:$0xff] (!%p173_p2)  }
   0xd   : > { %s2014_s16 = smov (!%p203_p3, %s1283_s16), 1  ;;  %v1540_v40 = vld [vmem:[%s2010_s2 + $0x160] ss:$8 sps:$4 sm:$0xff]   ;;  %v1541_v45 = vld [vmem:[%s2010_s2 + $0x174] ss:$8 sps:$4 sm:$0xff]   ;;  %vm1177_vm2 = vcmask 31744  }
   0xe   : > { %s1440_s9 = sshll.u32 %s2014_s16, 5  ;;  %v1543_v47 = vld [vmem:[%s2010_s2 + $0x170] ss:$8 sps:$4 sm:$0xff]   ;;  %v1548_v50 = vld [vmem:[%s2010_s2 + $0x4] ss:$8 sps:$4 sm:$0xff]   ;;  %s1442_s28 = sshll.u32 %s2014_s16, 4 }
   0xf   : > { %451 = vmatpush1.bf16.msra.mxu0 %v1516_v5  ;;  %919 = vmatpush1.bf16.msra.mxu1 %v1516_v5  ;;  %s1703_s12 = scalar_lea.vmem %s2009_s1, %s1440_s9  ;;  %s1714_s21 = scalar_lea.vmem %s2008_s0, %s1440_s9  ;;  %v1546_v53 = vld [vmem:[%s2010_s2] ss:$8 sps:$4 sm:$0xff]   ;;  %v1558_v55 = vld [vmem:[%s2010_s2 + $0x14] ss:$8 sps:$4 sm:$0xff]   ;;  %v1556_v58 = vld [vmem:[%s2010_s2 + $0x10] ss:$8 sps:$4 sm:$0xff]  }
  0x10   : > { %452 = vmatprep.subr.bf16.mxu0 %v1517_v6  ;;  %920 = vmatprep.subr.bf16.mxu1 %v1517_v6  ;;  %v1717_v11 = vld [vmem:[%s1703_s12 + $0x4] ss:$8 sps:$4 sm:$0xff]   ;;  %v1731_v15 = vld [vmem:[%s1714_s21 + $0x14] ss:$8 sps:$4 sm:$0xff]   ;;  %v1758_v29 = vld [vmem:[%s1714_s21] ss:$8 sps:$4 sm:$0xff]   ;;  %s217_s5 = scalar_lea.vmem %s2012_s4, %s1442_s28 }
  0x11   : > { %1370 = vmatprep.mubr.msk.bf16.mxu0 %vm439_vm0, %v1717_v11  ;;  %v1725_v13 = vld [vmem:[%s1714_s21 + $0x4] ss:$8 sps:$4 sm:$0xff]   ;;  %v715_v18 = vshll.u32 %v1731_v15, 16  ;;  %v1034_v27 = vshll.u32 %v1717_v11, 16  ;;  %v1032_v32 = vshrl.u32 %v1717_v11, 16  ;;  %v700_v35 = vshll.u32 %v1758_v29, 16 }
  0x12   : > { %v709_v16 = vshrl.u32 %v1725_v13, 16  ;;  %v711_v17 = vshll.u32 %v1725_v13, 16  ;;  %v1768_v34 = vld [vmem:[%s1714_s21 + $0x10] ss:$8 sps:$4 sm:$0xff]   ;;  %v1772_v36 = vld [vmem:[%s1703_s12 + $0x14] ss:$8 sps:$4 sm:$0xff]  }
  0x13   : > { %453 = vmatpush1.bf16.msra.mxu0 %v1519_v7  ;;  %921 = vmatpush1.bf16.msra.mxu1 %v1519_v7  ;;  %v717_v22 = vrot.slane %v715_v18, 1  ;;  %v1036_v33 = vrot.slane %v1034_v27, 1  ;;  %v1038_v39 = vshll.u32 %v1772_v36, 16  ;;  %v698_v41 = vshrl.u32 %v1758_v29, 16  ;;  %v1800_v52 = vld [vmem:[%s1703_s12] ss:$8 sps:$4 sm:$0xff]  }
  0x14   : > { %454 = vmatprep.subr.bf16.mxu0 %v1520_v8  ;;  %922 = vmatprep.subr.bf16.mxu1 %v1520_v8  ;;  %v713_v20 = vrot.slane %v711_v17, 1  ;;  %v702_v42 = vrot.slane %v700_v35, 1  ;;  %v705_v43 = vshll.u32 %v1768_v34, 16  ;;  %v722_v51 = vshrl.u32 %v1731_v15, 16  ;;  %v1561_v59 = vld [vmem:[%s2010_s2 + $0x24] ss:$8 sps:$4 sm:$0xff]  }
  0x15   : > { %v1037_v38 = vor.u32 %v1036_v33, %v1032_v32  ;;  %v1783_v44 = vrot.slane %v1038_v39, 1  ;;  %v719_v57 = vshrl.u32 %v1768_v34, 16  ;;  %v1827_v60 = vld [vmem:[%s1703_s12 + $0x10] ss:$8 sps:$4 sm:$0xff]   ;;  %v1559_v62 = vld [vmem:[%s2010_s2 + $0x20] ss:$8 sps:$4 sm:$0xff]  }
  0x16   : > { %v714_v23 = vor.u32 %v713_v20, %v709_v16  ;;  %v703_v48 = vor.u32 %v702_v42, %v698_v41  ;;  %v707_v49 = vrot.slane %v705_v43, 1  ;;  %v1811_v56 = vor.u32 %v722_v51, %v717_v22  ;;  %v1564_v63 = vld [vmem:[%s2010_s2 + $0x34] ss:$8 sps:$4 sm:$0xff]   ;;  %v1562_v0 = vld [vmem:[%s2010_s2 + $0x30] ss:$8 sps:$4 sm:$0xff]  }
  0x17   : > { %455 = vmatpush1.bf16.msra.mxu0 %v1522_v9  ;;  %923 = vmatpush1.bf16.msra.mxu1 %v1522_v9  ;;  %v1790_v46 = vsel %vm696_vm1, %v1037_v38, %v1783_v44  ;;  %v1567_v1 = vld [vmem:[%s2010_s2 + $0x44] ss:$8 sps:$4 sm:$0xff]   ;;  %v1565_v2 = vld [vmem:[%s2010_s2 + $0x40] ss:$8 sps:$4 sm:$0xff]   ;;  %v1570_v3 = vld [vmem:[%s2010_s2 + $0x54] ss:$8 sps:$4 sm:$0xff]  }
  0x18   : > { %456 = vmatprep.subr.bf16.mxu0 %v1523_v10  ;;  %924 = vmatprep.subr.bf16.mxu1 %v1523_v10  ;;  %v1746_v25 = vsel %vm696_vm1, %v714_v23, %v717_v22  ;;  %v1806_v54 = vsel %vm696_vm1, %v703_v48, %v707_v49  ;;  %v1829_v61 = vor.u32 %v719_v57, %v707_v49  ;;  %v1568_v4 = vld [vmem:[%s2010_s2 + $0x50] ss:$8 sps:$4 sm:$0xff]   ;;  %v1573_v5 = vld [vmem:[%s2010_s2 + $0x64] ss:$8 sps:$4 sm:$0xff]   ;;  %v1571_v6 = vld [vmem:[%s2010_s2 + $0x60] ss:$8 sps:$4 sm:$0xff]  }
  0x19   : > { %1428 = vmatprep.mubr.msk.bf16.mxu1 %vm439_vm0, %v1746_v25  ;;  %v1576_v7 = vld [vmem:[%s2010_s2 + $0x74] ss:$8 sps:$4 sm:$0xff]   ;;  %v1574_v8 = vld [vmem:[%s2010_s2 + $0x70] ss:$8 sps:$4 sm:$0xff]   ;;  %v1579_v9 = vld [vmem:[%s2010_s2 + $0x84] ss:$8 sps:$4 sm:$0xff]  }
  0x1a   : > { %v1577_v10 = vld [vmem:[%s2010_s2 + $0x80] ss:$8 sps:$4 sm:$0xff]   ;;  %v1591_v16 = vld [vmem:[%s2010_s2 + $0xb4] ss:$8 sps:$4 sm:$0xff]   ;;  %v1589_v17 = vld [vmem:[%s2010_s2 + $0xb0] ss:$8 sps:$4 sm:$0xff]  }
  0x1b   : > { %457 = vmatpush1.bf16.msra.mxu0 %v1525_v12  ;;  %925 = vmatpush1.bf16.msra.mxu1 %v1525_v12  ;;  %v1580_v12 = vld [vmem:[%s2010_s2 + $0x90] ss:$8 sps:$4 sm:$0xff]   ;;  %v1594_v18 = vld [vmem:[%s2010_s2 + $0x184] ss:$8 sps:$4 sm:$0xff]   ;;  %v1597_v20 = vld [vmem:[%s2010_s2 + $0x194] ss:$8 sps:$4 sm:$0xff]  }
  0x1c   : > { %458 = vmatprep.subr.bf16.mxu0 %v1526_v14  ;;  %926 = vmatprep.subr.bf16.mxu1 %v1526_v14  ;;  %v1585_v14 = vld [vmem:[%s2010_s2 + $0xa0] ss:$8 sps:$4 sm:$0xff]   ;;  %v1600_v22 = vld [vmem:[%s2010_s2 + $0x1a4] ss:$8 sps:$4 sm:$0xff]   ;;  %v1613_v32 = vld [vmem:[%s2010_s2 + $0x1f0] ss:$8 sps:$4 sm:$0xff]  }
  0x1d   : > { %v1598_v23 = vld [vmem:[%s2010_s2 + $0x1a0] ss:$8 sps:$4 sm:$0xff]   ;;  %v1618_v33 = vld [vmem:[%s2010_s2 + $0x204] ss:$8 sps:$4 sm:$0xff]   ;;  %v1621_v35 = vld [vmem:[%s2010_s2 + $0x214] ss:$8 sps:$4 sm:$0xff]  }
  0x1e   : > { %v1604_v27 = vld [vmem:[%s2010_s2 + $0x1c0] ss:$8 sps:$4 sm:$0xff]   ;;  %v1023_v38 = vshll.u32 %v1800_v52, 16  ;;  %v1624_v39 = vld [vmem:[%s2010_s2 + $0x224] ss:$8 sps:$4 sm:$0xff]   ;;  %v1021_v41 = vshrl.u32 %v1800_v52, 16 }
  0x1f   : > { %459 = vmatpush1.bf16.msra.mxu0 %v1528_v19  ;;  %927 = vmatpush1.bf16.msra.mxu1 %v1528_v19  ;;  %v1592_v19 = vld [vmem:[%s2010_s2 + $0x180] ss:$8 sps:$4 sm:$0xff]   ;;  %v1028_v43 = vshll.u32 %v1827_v60, 16  ;;  %v1045_v49 = vshrl.u32 %v1772_v36, 16  ;;  %vm1206_vm3 = vcmask 1010688  }
  0x20   : > { %460 = vmatprep.subr.bf16.mxu0 %v1529_v21  ;;  %928 = vmatprep.subr.bf16.mxu1 %v1529_v21  ;;  %v1595_v21 = vld [vmem:[%s2010_s2 + $0x190] ss:$8 sps:$4 sm:$0xff]   ;;  %v1025_v42 = vrot.slane %v1023_v38, 1  ;;  %vm1211_vm4 = vsmask.f32 3328 }
  0x21   : > { %v1030_v48 = vrot.slane %v1028_v43, 1  ;;  %v1047_v51 = vor.u32 %v1045_v49, %v1783_v44  ;;  %v1125_v44 = vld [vmem:[%s2011_s3] sm:$0x3]  ;;  %vm1212_vm5 = vmand %vm1206_vm3, %vm1211_vm4 }
  0x23   : > { %461 = vmatpush1.bf16.msra.mxu0 %v1531_v24  ;;  %929 = vmatpush1.bf16.msra.mxu1 %v1531_v24  ;;  %v1603_v24 = vld [vmem:[%s2010_s2 + $0x1b4] ss:$8 sps:$4 sm:$0xff]  }
  0x24   : > { %462 = vmatprep.subr.bf16.mxu0 %v1532_v26  ;;  %930 = vmatprep.subr.bf16.mxu1 %v1532_v26  ;;  %v1606_v26 = vld [vmem:[%s2010_s2 + $0x1c4] ss:$8 sps:$4 sm:$0xff]  }
  0x27   : > { %463 = vmatpush1.bf16.msra.mxu0 %v1534_v28  ;;  %931 = vmatpush1.bf16.msra.mxu1 %v1534_v28  ;;  %v1609_v28 = vld [vmem:[%s2010_s2 + $0x1d4] ss:$8 sps:$4 sm:$0xff]  }
  0x28   : > { %464 = vmatprep.subr.bf16.mxu0 %v1535_v30  ;;  %932 = vmatprep.subr.bf16.mxu1 %v1535_v30  ;;  %v1610_v30 = vld [vmem:[%s2010_s2 + $0x1e0] ss:$8 sps:$4 sm:$0xff]  }
  0x2b   : > { %465 = vmatpush1.bf16.msra.mxu0 %v1537_v31  ;;  %933 = vmatpush1.bf16.msra.mxu1 %v1537_v31  ;;  %v1615_v31 = vld [vmem:[%s2010_s2 + $0x1f4] ss:$8 sps:$4 sm:$0xff]  }
  0x2c   : > { %466 = vmatprep.subr.bf16.mxu0 %v1538_v37  ;;  %934 = vmatprep.subr.bf16.mxu1 %v1538_v37  ;;  %v1619_v37 = vld [vmem:[%s2010_s2 + $0x210] ss:$8 sps:$4 sm:$0xff]  }
  0x2f   : > { %467 = vmatpush1.bf16.msra.mxu0 %v1540_v40  ;;  %935 = vmatpush1.bf16.msra.mxu1 %v1540_v40  ;;  %v1622_v40 = vld [vmem:[%s2010_s2 + $0x220] ss:$8 sps:$4 sm:$0xff]  }
  0x30   : > { %468 = vmatprep.subr.bf16.mxu0 %v1541_v45  ;;  %936 = vmatprep.subr.bf16.mxu1 %v1541_v45  ;;  %v1627_v45 = vld [vmem:[%s2010_s2 + $0x234] ss:$8 sps:$4 sm:$0xff]  }
  0x33   : > { %469 = vmatpush1.bf16.msra.mxu0 %v1543_v47  ;;  %937 = vmatpush1.bf16.msra.mxu1 %v1543_v47  ;;  %v1026_v47 = vor.u32 %v1025_v42, %v1021_v41 }
  0x34   : > { %643 = vmatprep.subr.bf16.mxu0 %v1548_v50  ;;  %967 = vmatprep.subr.bf16.mxu1 %v1548_v50 }
  0x35   : > { %v1031_v50 = vsel %vm696_vm1, %v1026_v47, %v1030_v48 }
  0x36   : > { %479 = vmatmul.mubr.bf16.vlgmr.msra.gmra.mrb[0].mxu0 %v1800_v52  ;;  %947 = vmatmul.mubr.bf16.vlgmr.msra.gmra.mrb[0].mxu1 %v1806_v54 }
  0x37   : > { %644 = vmatpush1.bf16.msra.mxu0 %v1546_v53  ;;  %968 = vmatpush1.bf16.msra.mxu1 %v1546_v53 }
  0x38   : > { %645 = vmatprep.subr.bf16.mxu0 %v1558_v55  ;;  %969 = vmatprep.subr.bf16.mxu1 %v1558_v55 }
  0x39   : > { %1371 = vmatprep.mubr.msk.bf16.mxu0 %vm439_vm0, %v1772_v36  ;;  %1429 = vmatprep.mubr.msk.bf16.mxu1 %vm439_vm0, %v1811_v56 }
  0x3b   : > { %646 = vmatpush1.bf16.msra.mxu0 %v1556_v58  ;;  %970 = vmatpush1.bf16.msra.mxu1 %v1556_v58 }
  0x3c   : > { %647 = vmatprep.subr.bf16.mxu0 %v1561_v59  ;;  %971 = vmatprep.subr.bf16.mxu1 %v1561_v59 }
  0x3e   : > { %489 = vmatmul.mubr.bf16.gmra.mrb[4].mxu0 %v1827_v60  ;;  %957 = vmatmul.mubr.bf16.gmra.mrb[4].mxu1 %v1829_v61 }
  0x3f   : > { %648 = vmatpush1.bf16.msra.mxu0 %v1559_v62  ;;  %972 = vmatpush1.bf16.msra.mxu1 %v1559_v62 }
  0x40   : > { %649 = vmatprep.subr.bf16.mxu0 %v1564_v63  ;;  %973 = vmatprep.subr.bf16.mxu1 %v1564_v63 }
  0x41   : > { %1400 = vmatprep.mubr.msk.bf16.mxu0 %vm439_vm0, %v1725_v13  ;;  %1430 = vmatprep.mubr.msk.bf16.mxu1 %vm439_vm0, %v1717_v11  ;;  %v1582_v11 = vld [vmem:[%s2010_s2 + $0x94] ss:$8 sps:$4 sm:$0xff]   ;;  %v1587_v13 = vld [vmem:[%s2010_s2 + $0xa4] ss:$8 sps:$4 sm:$0xff]  }
  0x43   : > { %650 = vmatpush1.bf16.msra.mxu0 %v1562_v0  ;;  %974 = vmatpush1.bf16.msra.mxu1 %v1562_v0 }
  0x44   : > { %651 = vmatprep.subr.bf16.mxu0 %v1567_v1  ;;  %975 = vmatprep.subr.bf16.mxu1 %v1567_v1 }
  0x47   : > { %652 = vmatpush1.bf16.msra.mxu0 %v1565_v2  ;;  %976 = vmatpush1.bf16.msra.mxu1 %v1565_v2 }
  0x48   : > { %653 = vmatprep.subr.bf16.mxu0 %v1570_v3  ;;  %977 = vmatprep.subr.bf16.mxu1 %v1570_v3 }
  0x4b   : > { %654 = vmatpush1.bf16.msra.mxu0 %v1568_v4  ;;  %978 = vmatpush1.bf16.msra.mxu1 %v1568_v4 }
  0x4c   : > { %655 = vmatprep.subr.bf16.mxu0 %v1573_v5  ;;  %979 = vmatprep.subr.bf16.mxu1 %v1573_v5 }
  0x4f   : > { %656 = vmatpush1.bf16.msra.mxu0 %v1571_v6  ;;  %980 = vmatpush1.bf16.msra.mxu1 %v1571_v6 }
  0x50   : > { %657 = vmatprep.subr.bf16.mxu0 %v1576_v7  ;;  %981 = vmatprep.subr.bf16.mxu1 %v1576_v7 }
  0x53   : > { %658 = vmatpush1.bf16.msra.mxu0 %v1574_v8  ;;  %982 = vmatpush1.bf16.msra.mxu1 %v1574_v8 }
  0x54   : > { %659 = vmatprep.subr.bf16.mxu0 %v1579_v9  ;;  %983 = vmatprep.subr.bf16.mxu1 %v1579_v9 }
  0x57   : > { %660 = vmatpush1.bf16.msra.mxu0 %v1577_v10  ;;  %984 = vmatpush1.bf16.msra.mxu1 %v1577_v10 }
  0x58   : > { %661 = vmatprep.subr.bf16.mxu0 %v1582_v11  ;;  %985 = vmatprep.subr.bf16.mxu1 %v1582_v11 }
  0x5b   : > { %662 = vmatpush1.bf16.msra.mxu0 %v1580_v12  ;;  %986 = vmatpush1.bf16.msra.mxu1 %v1580_v12 }
  0x5c   : > { %663 = vmatprep.subr.bf16.mxu0 %v1587_v13  ;;  %987 = vmatprep.subr.bf16.mxu1 %v1587_v13 }
  0x5f   : > { %664 = vmatpush1.bf16.msra.mxu0 %v1585_v14  ;;  %988 = vmatpush1.bf16.msra.mxu1 %v1585_v14 }
  0x60   : > { %665 = vmatprep.subr.bf16.mxu0 %v1591_v16  ;;  %989 = vmatprep.subr.bf16.mxu1 %v1591_v16 }
  0x63   : > { %666 = vmatpush1.bf16.msra.mxu0 %v1589_v17  ;;  %990 = vmatpush1.bf16.msra.mxu1 %v1589_v17 }
  0x64   : > { %853 = vmatprep.subr.bf16.mxu0 %v1594_v18  ;;  %1056 = vmatprep.subr.bf16.mxu1 %v1594_v18 }
  0x66   : > { %676 = vmatmul.mubr.bf16.vlgmr.msra.gmra.mrb[0].mxu0 %v1758_v29  ;;  %1000 = vmatmul.mubr.bf16.vlgmr.msra.gmra.mrb[0].mxu1 %v1800_v52  ;;  %v1612_v29 = vld [vmem:[%s2010_s2 + $0x1e4] ss:$8 sps:$4 sm:$0xff]   ;;  %v1042_v52 = vshrl.u32 %v1827_v60, 16 }
  0x67   : > { %854 = vmatpush1.bf16.msra.mxu0 %v1592_v19  ;;  %1057 = vmatpush1.bf16.msra.mxu1 %v1592_v19 }
  0x68   : > { %855 = vmatprep.subr.bf16.mxu0 %v1597_v20  ;;  %1058 = vmatprep.subr.bf16.mxu1 %v1597_v20  ;;  %v1044_v53 = vor.u32 %v1042_v52, %v1030_v48 }
  0x69   : > { %1401 = vmatprep.mubr.msk.bf16.mxu0 %vm439_vm0, %v1731_v15  ;;  %1431 = vmatprep.mubr.msk.bf16.mxu1 %vm439_vm0, %v1772_v36  ;;  %v1601_v15 = vld [vmem:[%s2010_s2 + $0x1b0] ss:$8 sps:$4 sm:$0xff]   ;;  %v1127_v36 = vlaneseq }
  0x6b   : > { %856 = vmatpush1.bf16.msra.mxu0 %v1595_v21  ;;  %1059 = vmatpush1.bf16.msra.mxu1 %v1595_v21  ;;  %v1128_v55 = vshrl.u32 %v1127_v36, 7 }
  0x6c   : > { %857 = vmatprep.subr.bf16.mxu0 %v1600_v22  ;;  %1060 = vmatprep.subr.bf16.mxu1 %v1600_v22 }
  0x6d   : > { %v1129_v57 = vsub.s32 0, %v1128_v55 }
  0x6e   : > { %686 = vmatmul.mubr.bf16.gmra.mrb[4].mxu0 %v1768_v34  ;;  %1010 = vmatmul.mubr.bf16.gmra.mrb[4].mxu1 %v1827_v60  ;;  %v1616_v34 = vld [vmem:[%s2010_s2 + $0x200] ss:$8 sps:$4 sm:$0xff]  }
  0x6f   : > { %858 = vmatpush1.bf16.msra.mxu0 %v1598_v23  ;;  %1061 = vmatpush1.bf16.msra.mxu1 %v1598_v23  ;;  %v1130_v2 = vrot.slane %v1125_v44, %v1129_v57 }
  0x70   : > { %859 = vmatprep.subr.bf16.mxu0 %v1603_v24  ;;  %1062 = vmatprep.subr.bf16.mxu1 %v1603_v24 }
  0x71   : > { %1426 = vmatprep.mubr.msk.bf16.mxu0 %vm439_vm0, %v1746_v25  ;;  %1432 = vmatprep.mubr.msk.bf16.mxu1 %vm439_vm0, %v1790_v46  ;;  %v1607_v25 = vld [vmem:[%s2010_s2 + $0x1d0] ss:$8 sps:$4 sm:$0xff]  }
  0x72   : > { %v1625_v46 = vld [vmem:[%s2010_s2 + $0x230] ss:$8 sps:$4 sm:$0xff]  }
  0x73   : > { %860 = vmatpush1.bf16.msra.mxu0 %v1601_v15  ;;  %1063 = vmatpush1.bf16.msra.mxu1 %v1601_v15 }
  0x74   : > { %861 = vmatprep.subr.bf16.mxu0 %v1606_v26  ;;  %1064 = vmatprep.subr.bf16.mxu1 %v1606_v26 }
  0x77   : > { %862 = vmatpush1.bf16.msra.mxu0 %v1604_v27  ;;  %1065 = vmatpush1.bf16.msra.mxu1 %v1604_v27 }
  0x78   : > { %863 = vmatprep.subr.bf16.mxu0 %v1609_v28  ;;  %1066 = vmatprep.subr.bf16.mxu1 %v1609_v28 }
  0x7b   : > { %864 = vmatpush1.bf16.msra.mxu0 %v1607_v25  ;;  %1067 = vmatpush1.bf16.msra.mxu1 %v1607_v25 }
  0x7c   : > { %865 = vmatprep.subr.bf16.mxu0 %v1612_v29  ;;  %1068 = vmatprep.subr.bf16.mxu1 %v1612_v29 }
  0x7f   : > { %866 = vmatpush1.bf16.msra.mxu0 %v1610_v30  ;;  %1069 = vmatpush1.bf16.msra.mxu1 %v1610_v30 }
  0x80   : > { %867 = vmatprep.subr.bf16.mxu0 %v1615_v31  ;;  %1070 = vmatprep.subr.bf16.mxu1 %v1615_v31 }
  0x83   : > { %868 = vmatpush1.bf16.msra.mxu0 %v1613_v32  ;;  %1071 = vmatpush1.bf16.msra.mxu1 %v1613_v32 }
  0x84   : > { %869 = vmatprep.subr.bf16.mxu0 %v1618_v33  ;;  %1072 = vmatprep.subr.bf16.mxu1 %v1618_v33 }
  0x87   : > { %870 = vmatpush1.bf16.msra.mxu0 %v1616_v34  ;;  %1073 = vmatpush1.bf16.msra.mxu1 %v1616_v34 }
  0x88   : > { %871 = vmatprep.subr.bf16.mxu0 %v1621_v35  ;;  %1074 = vmatprep.subr.bf16.mxu1 %v1621_v35 }
  0x8b   : > { %872 = vmatpush1.bf16.msra.mxu0 %v1619_v37  ;;  %1075 = vmatpush1.bf16.msra.mxu1 %v1619_v37 }
  0x8c   : > { %873 = vmatprep.subr.bf16.mxu0 %v1624_v39  ;;  %1076 = vmatprep.subr.bf16.mxu1 %v1624_v39 }
  0x8f   : > { %874 = vmatpush1.bf16.msra.mxu0 %v1622_v40  ;;  %1077 = vmatpush1.bf16.msra.mxu1 %v1622_v40 }
  0x90   : > { %875 = vmatprep.subr.bf16.mxu0 %v1627_v45  ;;  %1078 = vmatprep.subr.bf16.mxu1 %v1627_v45 }
  0x93   : > { %876 = vmatpush1.bf16.msra.mxu0 %v1625_v46  ;;  %1079 = vmatpush1.bf16.msra.mxu1 %v1625_v46 }
  0x96   : > { %886 = vmatmul.mubr.bf16.vlgmr.msra.gmra.mrb[0].mxu0 %v1806_v54  ;;  %1089 = vmatmul.mubr.bf16.vlgmr.msra.gmra.mrb[0].mxu1 %v1031_v50  ;;  %v1133_v54 = vsub.s32 1, %v1128_v55 }
  0x97   : > { %1427 = vmatprep.mubr.msk.bf16.mxu0 %vm439_vm0, %v1811_v56  ;;  %1433 = vmatprep.mubr.msk.bf16.mxu1 %vm439_vm0, %v1047_v51 }
  0x98   : > { %v1134_v5 = vrot.slane %v1125_v44, %v1133_v54  ;;  %v1213_v44 = vld [vmem:[%s217_s5 + $0xc] sm:$0xf] }
  0x9e   : > { %896 = vmatmul.mubr.bf16.gmra.mrb[4].mxu0 %v1829_v61  ;;  %1099 = vmatmul.mubr.bf16.gmra.mrb[4].mxu1 %v1044_v53 }
 0x169   : > { %v887_v58 = vpop.f32.mrb[0].mxu0  ;;  %v1090_v59 = vpop.f32.mrb[0].mxu1 }
 0x16a   : > { %v1117_v60 = vmax.f32 %v887_v58, %v1090_v59  ;;  %v889_v62 = vpop.f32.mrb[1].mxu0  ;;  %v1092_v63 = vpop.f32.mrb[1].mxu1 }
 0x16b   : > { %v1118_v56 = vmax.f32 %v889_v62, %v1092_v63  ;;  %v891_v0 = vpop.f32.mrb[2].mxu0  ;;  %v1094_v1 = vpop.f32.mrb[2].mxu1 }
 0x16c   : > { %v1119_v3 = vmax.f32 %v891_v0, %v1094_v1  ;;  %v893_v61 = vpop.f32.mrb[3].mxu0  ;;  %v1096_v4 = vpop.f32.mrb[3].mxu1  ;;  %v1137_v25 = vadd.f32 %v1130_v2, %v1117_v60 }
 0x16d   : > { %v1120_v6 = vmax.f32 %v893_v61, %v1096_v4  ;;  %v1138_v29 = vadd.f32 %v1134_v5, %v1118_v56 }
 0x16e   : > { %v1139_v7 = vadd.f32 %v1130_v2, %v1119_v3  ;;  %v1145_v35 = vmax.f32 %v1137_v25, 0.0 }
 0x16f   : > { %v1140_v8 = vadd.f32 %v1134_v5, %v1120_v6  ;;  %v1146_v37 = vmax.f32 %v1138_v29, 0.0 }
 0x170   : > { %v1147_v9 = vmax.f32 %v1139_v7, 0.0 }
 0x171   : > { %v1148_v10 = vmax.f32 %v1140_v8, 0.0  ;;  %v897_v11 = vpop.f32.mrb[4].mxu0  ;;  %v1100_v12 = vpop.f32.mrb[4].mxu1  ;;  %v1493_v39 = vpack.i.bf16 %v1146_v37, %v1145_v35 }
 0x172   : > { %v1121_v13 = vmax.f32 %v897_v11, %v1100_v12  ;;  %v899_v14 = vpop.f32.mrb[5].mxu0  ;;  %v1102_v16 = vpop.f32.mrb[5].mxu1 }
 0x173   : > { %v1122_v17 = vmax.f32 %v899_v14, %v1102_v16  ;;  %v901_v18 = vpop.f32.mrb[6].mxu0  ;;  %v1104_v19 = vpop.f32.mrb[6].mxu1  ;;  %v1498_v20 = vpack.i.bf16 %v1148_v10, %v1147_v9 }
 0x174   : > { %v1141_v21 = vadd.f32 %v1130_v2, %v1121_v13  ;;  %v1123_v22 = vmax.f32 %v901_v18, %v1104_v19  ;;  %v903_v23 = vpop.f32.mrb[7].mxu0  ;;  %v1106_v24 = vpop.f32.mrb[7].mxu1 }
 0x175   : > { %v1142_v15 = vadd.f32 %v1134_v5, %v1122_v17  ;;  %v1124_v26 = vmax.f32 %v903_v23, %v1106_v24  ;;  %1499 = vrot.lane.b32.xlu1 %v1498_v20, %s1636_s27 }
 0x176   : > { %v1149_v27 = vmax.f32 %v1141_v21, 0.0  ;;  %v1143_v28 = vadd.f32 %v1130_v2, %v1123_v22 }
 0x177   : > { %v1150_v30 = vmax.f32 %v1142_v15, 0.0  ;;  %v1144_v31 = vadd.f32 %v1134_v5, %v1124_v26 }
 0x178   : > { %v1151_v32 = vmax.f32 %v1143_v28, 0.0 }
 0x179   : > { %v1152_v33 = vmax.f32 %v1144_v31, 0.0  ;;  %v1503_v34 = vpack.i.bf16 %v1150_v30, %v1149_v27 }
 0x17b   : > { %1504 = vrot.lane.b32.xlu1 %v1503_v34, %s1636_s27  ;;  %v1488_v38 = vpack.i.bf16 %v1152_v33, %v1151_v32 }
 0x17d   : > { %1489 = vrot.lane.b32.xlu0 %v1488_v38, %s1636_s27 }
 0x181   : > { %1494 = vrot.lane.b32.xlu0 %v1493_v39, %s1636_s27 }
 0x1e7   : > { %v1500_v40 = vpop.permute.xlu1 %1499 }
 0x1e8   : > { %v1502_v41 = vunpack.i.h.bf16 %v1500_v40  ;;  %v1501_v42 = vunpack.i.l.bf16 %v1500_v40 }
 0x1ea   : > { %v1179_v43 = vsel %vm1177_vm2, %v1501_v42, %v1502_v41 }
 0x1eb   : > { %v1187_v45 = vmax.f32 %v1147_v9, %v1179_v43 }
 0x1ed   : > { %v1444_v46 = vpack.c.bf16 %v1187_v45, %v1187_v45  ;;  %v1505_v47 = vpop.permute.xlu1 %1504 }
 0x1ee   : > { %v1507_v48 = vunpack.i.h.bf16 %v1505_v47  ;;  %v1506_v49 = vunpack.i.l.bf16 %v1505_v47 }
 0x1ef   : > { %1208 = vst.msk [vmem:[%s217_s5 + $0x4] sm:$0xf] %vm1206_vm3, %v1444_v46  ;;  %v1490_v50 = vpop.permute.xlu0 %1489 }
 0x1f0   : > { %v1180_v51 = vsel %vm1177_vm2, %v1506_v49, %v1507_v48  ;;  %v1492_v52 = vunpack.i.h.bf16 %v1490_v50  ;;  %v1491_v53 = vunpack.i.l.bf16 %v1490_v50 }
 0x1f1   : > { %v1188_v36 = vmax.f32 %v1149_v27, %v1180_v51 }
 0x1f2   : > { %v1181_v55 = vsel %vm1177_vm2, %v1491_v53, %v1492_v52 }
 0x1f3   : > { %v1445_v57 = vpack.c.bf16 %v1188_v36, %v1188_v36  ;;  %v1189_v58 = vmax.f32 %v1151_v32, %v1181_v55  ;;  %v1495_v59 = vpop.permute.xlu0 %1494 }
 0x1f4   : > { %v1497_v54 = vunpack.i.h.bf16 %v1495_v59  ;;  %v1496_v60 = vunpack.i.l.bf16 %v1495_v59 }
 0x1f5   : > { %1209 = vst.msk [vmem:[%s217_s5 + $0x8] sm:$0xf] %vm1206_vm3, %v1445_v57  ;;  %v1446_v62 = vpack.c.bf16 %v1189_v58, %v1189_v58 }
 0x1f6   : > { %v1178_v63 = vsel %vm1177_vm2, %v1496_v60, %v1497_v54 }
 0x1f7   : > { %v1214_v56 = vsel %vm1212_vm5, %v1446_v62, %v1213_v44  ;;  %v1186_v0 = vmax.f32 %v1145_v35, %v1178_v63 }
 0x1f8   : > { %1215 = vst [vmem:[%s217_s5 + $0xc] sm:$0xf] %v1214_v56 }
 0x1f9   : > { %v1443_v1 = vpack.c.bf16 %v1186_v0, %v1186_v0 }
 0x1fb   : > { %1207 = vst.msk [vmem:[%s217_s5] sm:$0xf] %vm1206_vm3, %v1443_v1 }
 0x1fc PF: > { %s14_s15 = sadd.s32 1, %s1634_s15  }
 0x1fd   : > { %p11_p4 = scmp.ge.s32.totalorder %s14_s15, 4  }
 0x1ff   :  { %13 = sbr.rel (!%p11_p4) target bundleno = 1 (0x1), region = 71 }

// kernel: net_forward.6
= control target key start
LH: loop header
LB: loop body
LE: loop exit
PB: predicated region body
PF: predicated region fallthrough
CT: control target
= control target key end

     0   :  { %s1222_s15 = smov 0   ;;  %s1441_s0 = inlined_call_operand.vmem [shape: bf16[2,15,124], index: 0, kind: input, shape index: {}]   ;;  %s1442_s1 = inlined_call_operand.vmem [shape: bf16[2,15,124], index: 1, kind: input, shape index: {}]   ;;  %s1443_s2 = inlined_call_operand.vmem [shape: bf16[3,124,224], index: 2, kind: input, shape index: {}]   ;;  %s1444_s3 = inlined_call_operand.vmem [shape: f32[1,224], index: 3, kind: input, shape index: {}]   ;;  %s1445_s4 = inlined_call_operand.vmem [shape: bf16[2,14,112], index: 4, kind: output, shape index: {}]  }
   0x1 LB: > { %s959_s16 = sadd.s32 4294967295, %s1193_s15   ;;  %p963_p0 = scmp.ge.s32.totalorder %s1193_s15, 1  ;;  %s1193_s15 = sphi %s1222_s15, %s14_s15  }
   0x2   : > { %p172_p1 = scmp.lt.s32.totalorder %s1193_s15, 3 }
   0x4   : > { %p173_p2 = pnand %p963_p0, %p172_p1 }
   0x5   : > { %v1111_v0 = vld [vmem:[%s1443_s2 + $0x84] ss:$8 sps:$4 sm:$0xff] (!%p173_p2)   ;;  %v1113_v1 = vld [vmem:[%s1443_s2 + $0x80] ss:$8 sps:$4 sm:$0xff] (!%p173_p2)   ;;  %v1195_v2 = vmov (!%p173_p2), 0   ;;  %p203_p3 = scmp.lt.s32.totalorder (!%p173_p2), %s959_s16, 1 }
   0x6   : > { %176 = sbr.rel (%p173_p2) target bundleno = 451 (0x1c3), region = 36  ;;  %401 = vmatprep.mubr.bf16.mxu0 (!%p173_p2), %v1195_v2  ;;  %723 = vmatprep.mubr.bf16.mxu1 (!%p173_p2), %v1195_v2  ;;  %v1114_v3 = vld [vmem:[%s1443_s2 + $0x94] ss:$8 sps:$4 sm:$0xff] (!%p173_p2)   ;;  %v1116_v4 = vld [vmem:[%s1443_s2 + $0x90] ss:$8 sps:$4 sm:$0xff] (!%p173_p2)   ;;  %vm362_vm0 = vcmask (!%p173_p2), 1045504  }
   0x7   : > { %369 = vmatprep.subr.bf16.mxu0 (!%p173_p2), %v1111_v0  ;;  %691 = vmatprep.subr.bf16.mxu1 (!%p173_p2), %v1111_v0  ;;  %v1117_v5 = vld [vmem:[%s1443_s2 + $0xa4] ss:$8 sps:$4 sm:$0xff] (!%p173_p2)   ;;  %v1119_v6 = vld [vmem:[%s1443_s2 + $0xa0] ss:$8 sps:$4 sm:$0xff] (!%p173_p2)   ;;  %v1120_v7 = vld [vmem:[%s1443_s2 + $0xb4] ss:$8 sps:$4 sm:$0xff] (!%p173_p2)  }
   0x8   : > { %370 = vmatpush1.bf16.msra.mxu0 (!%p173_p2), %v1113_v1  ;;  %692 = vmatpush1.bf16.msra.mxu1 (!%p173_p2), %v1113_v1  ;;  %v1122_v8 = vld [vmem:[%s1443_s2 + $0xb0] ss:$8 sps:$4 sm:$0xff] (!%p173_p2)   ;;  %v1123_v9 = vld [vmem:[%s1443_s2 + $0xc4] ss:$8 sps:$4 sm:$0xff] (!%p173_p2)   ;;  %v1125_v10 = vld [vmem:[%s1443_s2 + $0xc0] ss:$8 sps:$4 sm:$0xff] (!%p173_p2)  }
   0x9   : > { %371 = vmatprep.subr.bf16.mxu0 (!%p173_p2), %v1114_v3  ;;  %693 = vmatprep.subr.bf16.mxu1 (!%p173_p2), %v1114_v3  ;;  %v1126_v13 = vld [vmem:[%s1443_s2 + $0xd4] ss:$8 sps:$4 sm:$0xff] (!%p173_p2)   ;;  %v1128_v15 = vld [vmem:[%s1443_s2 + $0xd0] ss:$8 sps:$4 sm:$0xff] (!%p173_p2)   ;;  %v1129_v16 = vld [vmem:[%s1443_s2 + $0xe4] ss:$8 sps:$4 sm:$0xff] (!%p173_p2)  }
   0xa   : > { %v1131_v18 = vld [vmem:[%s1443_s2 + $0xe0] ss:$8 sps:$4 sm:$0xff] (!%p173_p2)   ;;  %v1132_v19 = vld [vmem:[%s1443_s2 + $0xf4] ss:$8 sps:$4 sm:$0x3f] (!%p173_p2)   ;;  %vm358_vm1 = vcmask (!%p173_p2), 1014784  }
   0xb   : > { %v1134_v20 = vld [vmem:[%s1443_s2 + $0xf0] ss:$8 sps:$4 sm:$0x3f] (!%p173_p2)   ;;  %v1137_v26 = vld [vmem:[%s1443_s2 + $0x4] ss:$8 sps:$4 sm:$0xff] (!%p173_p2)   ;;  %s1196_s27 = smov (!%p173_p2), 16  }
   0xc   : > { %372 = vmatpush1.bf16.msra.mxu0 (!%p173_p2), %v1116_v4  ;;  %694 = vmatpush1.bf16.msra.mxu1 (!%p173_p2), %v1116_v4  ;;  %v364_v25 = vsel (!%p173_p2), %vm362_vm0, %v1134_v20, 0  ;;  %v1135_v29 = vld [vmem:[%s1443_s2] ss:$8 sps:$4 sm:$0xff] (!%p173_p2)   ;;  %v1143_v30 = vld [vmem:[%s1443_s2 + $0x14] ss:$8 sps:$4 sm:$0xff] (!%p173_p2)   ;;  %vm873_vm2 = vcmask (!%p173_p2), 130048  }
   0xd   : > { %s1447_s16 = smov (!%p203_p3, %s959_s16), 1  ;;  %373 = vmatprep.subr.bf16.mxu0 %v1117_v5  ;;  %695 = vmatprep.subr.bf16.mxu1 %v1117_v5  ;;  %v1141_v31 = vld [vmem:[%s1443_s2 + $0x10] ss:$8 sps:$4 sm:$0xff]   ;;  %v1146_v32 = vld [vmem:[%s1443_s2 + $0x24] ss:$8 sps:$4 sm:$0xff]   ;;  %vm888_vm3 = vcmask 912384  }
   0xe   : > { %s1253_s5 = sshll.u32 %s1447_s16, 3  ;;  %v1144_v33 = vld [vmem:[%s1443_s2 + $0x20] ss:$8 sps:$4 sm:$0xff]   ;;  %v1149_v34 = vld [vmem:[%s1443_s2 + $0x34] ss:$8 sps:$4 sm:$0xff]   ;;  %vm890_vm4 = vcmask 911360  }
   0xf   : > { %s1262_s10 = scalar_lea.vmem %s1441_s0, %s1253_s5  ;;  %s1294_s28 = scalar_lea.vmem %s1442_s1, %s1253_s5  ;;  %v1147_v35 = vld [vmem:[%s1443_s2 + $0x30] ss:$8 sps:$4 sm:$0xff]   ;;  %v1152_v36 = vld [vmem:[%s1443_s2 + $0x44] ss:$8 sps:$4 sm:$0xff]   ;;  %v1150_v37 = vld [vmem:[%s1443_s2 + $0x40] ss:$8 sps:$4 sm:$0xff]  }
  0x10   : > { %374 = vmatpush1.bf16.msra.mxu0 %v1119_v6  ;;  %696 = vmatpush1.bf16.msra.mxu1 %v1119_v6  ;;  %v1271_v11 = vld [vmem:[%s1262_s10] sm:$0xf]  ;;  %v271_v12 = vld [vmem:[%s1262_s10 + $0x4] sm:$0xf]  ;;  %v1155_v38 = vld [vmem:[%s1443_s2 + $0x54] ss:$8 sps:$4 sm:$0xff]   ;;  %v843_v6 = vlaneseq  ;;  %s217_s6 = scalar_lea.vmem %s1445_s4, %s1253_s5 }
  0x11   : > { %375 = vmatprep.subr.bf16.mxu0 %v1120_v7  ;;  %697 = vmatprep.subr.bf16.mxu1 %v1120_v7  ;;  %v1040_v14 = vcombine.low %v1271_v11, %v271_v12  ;;  %v1300_v21 = vld [vmem:[%s1294_s28] sm:$0xf]  ;;  %v273_v24 = vld [vmem:[%s1294_s28 + $0x4] sm:$0x7]  ;;  %v1153_v39 = vld [vmem:[%s1443_s2 + $0x50] ss:$8 sps:$4 sm:$0xff]  }
  0x12   : > { %v1310_v27 = vcombine.low %v1300_v21, %v273_v24  ;;  %v1158_v40 = vld [vmem:[%s1443_s2 + $0x64] ss:$8 sps:$4 sm:$0xff]   ;;  %v1156_v41 = vld [vmem:[%s1443_s2 + $0x60] ss:$8 sps:$4 sm:$0xff]   ;;  %v1168_v49 = vld [vmem:[%s1443_s2 + $0x114] ss:$8 sps:$4 sm:$0xff]  }
  0x13   : > { %v553_v17 = vshll.u32 %v1040_v14, 16  ;;  %v551_v22 = vshrl.u32 %v1040_v14, 16  ;;  %v1159_v42 = vld [vmem:[%s1443_s2 + $0x74] ss:$8 sps:$4 sm:$0x3f]   ;;  %v844_v7 = vshrl.u32 %v843_v6, 7 }
  0x14   : > { %376 = vmatpush1.bf16.msra.mxu0 %v1122_v8  ;;  %698 = vmatpush1.bf16.msra.mxu1 %v1122_v8  ;;  %v1161_v43 = vld [vmem:[%s1443_s2 + $0x70] ss:$8 sps:$4 sm:$0x3f]   ;;  %v270_v44 = vld [vmem:[%s1262_s10 + $0x4] sm:$0x7] }
  0x15   : > { %377 = vmatprep.subr.bf16.mxu0 %v1123_v9  ;;  %699 = vmatprep.subr.bf16.mxu1 %v1123_v9  ;;  %v555_v23 = vrot.slane %v553_v17, 1  ;;  %v499_v45 = vsel %vm362_vm0, %v1161_v43, 0  ;;  %v1164_v46 = vld [vmem:[%s1443_s2 + $0x104] ss:$8 sps:$4 sm:$0xff]   ;;  %v1021_v47 = vcombine.low %v1271_v11, %v270_v44  ;;  %v1162_v48 = vld [vmem:[%s1443_s2 + $0x100] ss:$8 sps:$4 sm:$0xff]  }
  0x16   : > { %v1166_v50 = vld [vmem:[%s1443_s2 + $0x110] ss:$8 sps:$4 sm:$0xff]   ;;  %v1171_v51 = vld [vmem:[%s1443_s2 + $0x124] ss:$8 sps:$4 sm:$0xff]   ;;  %v1169_v52 = vld [vmem:[%s1443_s2 + $0x120] ss:$8 sps:$4 sm:$0xff]  }
  0x17   : > { %v1312_v28 = vor.u32 %v555_v23, %v551_v22  ;;  %v1174_v53 = vld [vmem:[%s1443_s2 + $0x134] ss:$8 sps:$4 sm:$0xff]   ;;  %v1172_v54 = vld [vmem:[%s1443_s2 + $0x130] ss:$8 sps:$4 sm:$0xff]   ;;  %v1177_v55 = vld [vmem:[%s1443_s2 + $0x144] ss:$8 sps:$4 sm:$0xff]  }
  0x18   : > { %378 = vmatpush1.bf16.msra.mxu0 %v1125_v10  ;;  %700 = vmatpush1.bf16.msra.mxu1 %v1125_v10  ;;  %v274_v56 = vld [vmem:[%s1294_s28 + $0x4] sm:$0xf]  ;;  %v1175_v57 = vld [vmem:[%s1443_s2 + $0x140] ss:$8 sps:$4 sm:$0xff]   ;;  %v1180_v58 = vld [vmem:[%s1443_s2 + $0x154] ss:$8 sps:$4 sm:$0xff]  }
  0x19   : > { %379 = vmatprep.subr.bf16.mxu0 %v1126_v13  ;;  %701 = vmatprep.subr.bf16.mxu1 %v1126_v13  ;;  %v1063_v59 = vcombine.low %v1300_v21, %v274_v56  ;;  %v1178_v60 = vld [vmem:[%s1443_s2 + $0x150] ss:$8 sps:$4 sm:$0xff]   ;;  %v1183_v61 = vld [vmem:[%s1443_s2 + $0x164] ss:$8 sps:$4 sm:$0xff]   ;;  %v1181_v63 = vld [vmem:[%s1443_s2 + $0x160] ss:$8 sps:$4 sm:$0xff]  }
  0x1a   : > { %v1184_v0 = vld [vmem:[%s1443_s2 + $0x174] ss:$8 sps:$4 sm:$0x3f]   ;;  %v1186_v1 = vld [vmem:[%s1443_s2 + $0x170] ss:$8 sps:$4 sm:$0x3f]  }
  0x1b   : > { %v783_v62 = vshll.u32 %v1063_v59, 16  ;;  %v639_v4 = vsel %vm362_vm0, %v1186_v1, 0  ;;  %v845_v8 = vsub.s32 0, %v844_v7  ;;  %v841_v9 = vld [vmem:[%s1444_s3] sm:$0x3]  ;;  %v849_v10 = vsub.s32 1, %v844_v7 }
  0x1c   : > { %380 = vmatpush1.bf16.msra.mxu0 %v1128_v15  ;;  %702 = vmatpush1.bf16.msra.mxu1 %v1128_v15 }
  0x1d   : > { %381 = vmatprep.subr.bf16.mxu0 %v1129_v16  ;;  %703 = vmatprep.subr.bf16.mxu1 %v1129_v16  ;;  %v785_v3 = vrot.slane %v783_v62, 1  ;;  %v846_v11 = vrot.slane %v841_v9, %v845_v8  ;;  %v850_v14 = vrot.slane %v841_v9, %v849_v10 }
  0x20   : > { %382 = vmatpush1.bf16.msra.mxu0 %v1131_v18  ;;  %704 = vmatpush1.bf16.msra.mxu1 %v1131_v18 }
  0x21   : > { %1019 = vmatprep.subr.msk.bf16.mxu0 %vm362_vm0, %v1132_v19  ;;  %1059 = vmatprep.subr.msk.bf16.mxu1 %vm362_vm0, %v1132_v19 }
  0x24   : > { %384 = vmatpush1.bf16.msra.mxu0 %v364_v25  ;;  %706 = vmatpush1.bf16.msra.mxu1 %v364_v25 }
  0x25   : > { %504 = vmatprep.subr.bf16.mxu0 %v1137_v26  ;;  %734 = vmatprep.subr.bf16.mxu1 %v1137_v26 }
  0x27   : > { %1020 = vmatmul.mubr.msk.bf16.vlgmr.msra.gmra.mrb[0].mxu0 %vm358_vm1, %v1310_v27  ;;  %1060 = vmatmul.mubr.msk.bf16.vlgmr.msra.gmra.mrb[0].mxu1 %vm358_vm1, %v1312_v28 }
  0x28   : > { %505 = vmatpush1.bf16.msra.mxu0 %v1135_v29  ;;  %735 = vmatpush1.bf16.msra.mxu1 %v1135_v29 }
  0x29   : > { %506 = vmatprep.subr.bf16.mxu0 %v1143_v30  ;;  %736 = vmatprep.subr.bf16.mxu1 %v1143_v30 }
  0x2a   : > { %536 = vmatprep.mubr.bf16.mxu0 %v1195_v2  ;;  %766 = vmatprep.mubr.bf16.mxu1 %v1195_v2 }
  0x2c   : > { %507 = vmatpush1.bf16.msra.mxu0 %v1141_v31  ;;  %737 = vmatpush1.bf16.msra.mxu1 %v1141_v31 }
  0x2d   : > { %508 = vmatprep.subr.bf16.mxu0 %v1146_v32  ;;  %738 = vmatprep.subr.bf16.mxu1 %v1146_v32 }
  0x30   : > { %509 = vmatpush1.bf16.msra.mxu0 %v1144_v33  ;;  %739 = vmatpush1.bf16.msra.mxu1 %v1144_v33 }
  0x31   : > { %510 = vmatprep.subr.bf16.mxu0 %v1149_v34  ;;  %740 = vmatprep.subr.bf16.mxu1 %v1149_v34 }
  0x34   : > { %511 = vmatpush1.bf16.msra.mxu0 %v1147_v35  ;;  %741 = vmatpush1.bf16.msra.mxu1 %v1147_v35 }
  0x35   : > { %512 = vmatprep.subr.bf16.mxu0 %v1152_v36  ;;  %742 = vmatprep.subr.bf16.mxu1 %v1152_v36 }
  0x38   : > { %513 = vmatpush1.bf16.msra.mxu0 %v1150_v37  ;;  %743 = vmatpush1.bf16.msra.mxu1 %v1150_v37 }
  0x39   : > { %514 = vmatprep.subr.bf16.mxu0 %v1155_v38  ;;  %744 = vmatprep.subr.bf16.mxu1 %v1155_v38 }
  0x3c   : > { %515 = vmatpush1.bf16.msra.mxu0 %v1153_v39  ;;  %745 = vmatpush1.bf16.msra.mxu1 %v1153_v39 }
  0x3d   : > { %516 = vmatprep.subr.bf16.mxu0 %v1158_v40  ;;  %746 = vmatprep.subr.bf16.mxu1 %v1158_v40 }
  0x40   : > { %517 = vmatpush1.bf16.msra.mxu0 %v1156_v41  ;;  %747 = vmatpush1.bf16.msra.mxu1 %v1156_v41 }
  0x41   : > { %1038 = vmatprep.subr.msk.bf16.mxu0 %vm362_vm0, %v1159_v42  ;;  %1061 = vmatprep.subr.msk.bf16.mxu1 %vm362_vm0, %v1159_v42 }
  0x44   : > { %519 = vmatpush1.bf16.msra.mxu0 %v499_v45  ;;  %749 = vmatpush1.bf16.msra.mxu1 %v499_v45 }
  0x45   : > { %644 = vmatprep.subr.bf16.mxu0 %v1164_v46  ;;  %790 = vmatprep.subr.bf16.mxu1 %v1164_v46 }
  0x47   : > { %1039 = vmatmul.mubr.msk.bf16.vlgmr.msra.gmra.mrb[0].mxu0 %vm358_vm1, %v1021_v47  ;;  %1062 = vmatmul.mubr.msk.bf16.vlgmr.msra.gmra.mrb[0].mxu1 %vm358_vm1, %v1310_v27 }
  0x48   : > { %645 = vmatpush1.bf16.msra.mxu0 %v1162_v48  ;;  %791 = vmatpush1.bf16.msra.mxu1 %v1162_v48 }
  0x49   : > { %646 = vmatprep.subr.bf16.mxu0 %v1168_v49  ;;  %792 = vmatprep.subr.bf16.mxu1 %v1168_v49 }
  0x4a   : > { %676 = vmatprep.mubr.bf16.mxu0 %v1195_v2  ;;  %822 = vmatprep.mubr.bf16.mxu1 %v1195_v2  ;;  %v781_v2 = vshrl.u32 %v1063_v59, 16 }
  0x4c   : > { %647 = vmatpush1.bf16.msra.mxu0 %v1166_v50  ;;  %793 = vmatpush1.bf16.msra.mxu1 %v1166_v50  ;;  %v786_v5 = vor.u32 %v785_v3, %v781_v2 }
  0x4d   : > { %648 = vmatprep.subr.bf16.mxu0 %v1171_v51  ;;  %794 = vmatprep.subr.bf16.mxu1 %v1171_v51 }
  0x50   : > { %649 = vmatpush1.bf16.msra.mxu0 %v1169_v52  ;;  %795 = vmatpush1.bf16.msra.mxu1 %v1169_v52 }
  0x51   : > { %650 = vmatprep.subr.bf16.mxu0 %v1174_v53  ;;  %796 = vmatprep.subr.bf16.mxu1 %v1174_v53 }
  0x54   : > { %651 = vmatpush1.bf16.msra.mxu0 %v1172_v54  ;;  %797 = vmatpush1.bf16.msra.mxu1 %v1172_v54 }
  0x55   : > { %652 = vmatprep.subr.bf16.mxu0 %v1177_v55  ;;  %798 = vmatprep.subr.bf16.mxu1 %v1177_v55 }
  0x58   : > { %653 = vmatpush1.bf16.msra.mxu0 %v1175_v57  ;;  %799 = vmatpush1.bf16.msra.mxu1 %v1175_v57 }
  0x59   : > { %654 = vmatprep.subr.bf16.mxu0 %v1180_v58  ;;  %800 = vmatprep.subr.bf16.mxu1 %v1180_v58 }
  0x5c   : > { %655 = vmatpush1.bf16.msra.mxu0 %v1178_v60  ;;  %801 = vmatpush1.bf16.msra.mxu1 %v1178_v60 }
  0x5d   : > { %656 = vmatprep.subr.bf16.mxu0 %v1183_v61  ;;  %802 = vmatprep.subr.bf16.mxu1 %v1183_v61 }
  0x60   : > { %657 = vmatpush1.bf16.msra.mxu0 %v1181_v63  ;;  %803 = vmatpush1.bf16.msra.mxu1 %v1181_v63 }
  0x61   : > { %1057 = vmatprep.subr.msk.bf16.mxu0 %vm362_vm0, %v1184_v0  ;;  %1064 = vmatprep.subr.msk.bf16.mxu1 %vm362_vm0, %v1184_v0 }
  0x64   : > { %659 = vmatpush1.bf16.msra.mxu0 %v639_v4  ;;  %805 = vmatpush1.bf16.msra.mxu1 %v639_v4 }
  0x67   : > { %1058 = vmatmul.mubr.msk.bf16.vlgmr.msra.gmra.mrb[0].mxu0 %vm358_vm1, %v1312_v28  ;;  %1065 = vmatmul.mubr.msk.bf16.vlgmr.msra.gmra.mrb[0].mxu1 %vm358_vm1, %v786_v5 }
 0x13a   : > { %v678_v12 = vpop.f32.mrb[0].mxu0  ;;  %v824_v13 = vpop.f32.mrb[0].mxu1 }
 0x13b   : > { %v837_v15 = vmax.f32 %v678_v12, %v824_v13  ;;  %v680_v16 = vpop.f32.mrb[1].mxu0  ;;  %v826_v17 = vpop.f32.mrb[1].mxu1 }
 0x13c   : > { %v838_v18 = vmax.f32 %v680_v16, %v826_v17  ;;  %v682_v19 = vpop.f32.mrb[2].mxu0  ;;  %v828_v20 = vpop.f32.mrb[2].mxu1 }
 0x13d   : > { %v853_v21 = vadd.f32 %v846_v11, %v837_v15  ;;  %v839_v22 = vmax.f32 %v682_v19, %v828_v20  ;;  %v684_v23 = vpop.f32.mrb[3].mxu0  ;;  %v830_v24 = vpop.f32.mrb[3].mxu1 }
 0x13e   : > { %v854_v25 = vadd.f32 %v850_v14, %v838_v18  ;;  %v840_v26 = vmax.f32 %v684_v23, %v830_v24 }
 0x13f   : > { %v857_v27 = vmax.f32 %v853_v21, 0.0  ;;  %v855_v28 = vadd.f32 %v846_v11, %v839_v22 }
 0x140   : > { %v858_v29 = vmax.f32 %v854_v25, 0.0  ;;  %v856_v30 = vadd.f32 %v850_v14, %v840_v26 }
 0x141   : > { %v859_v31 = vmax.f32 %v855_v28, 0.0 }
 0x142   : > { %v860_v32 = vmax.f32 %v856_v30, 0.0  ;;  %v1101_v33 = vpack.i.bf16 %v858_v29, %v857_v27 }
 0x144   : > { %1102 = vrot.lane.b32.xlu0 %v1101_v33, %s1196_s27  ;;  %v1106_v34 = vpack.i.bf16 %v860_v32, %v859_v31 }
 0x148   : > { %1107 = vrot.lane.b32.xlu0 %v1106_v34, %s1196_s27 }
 0x1b6   : > { %v1103_v35 = vpop.permute.xlu0 %1102 }
 0x1b7   : > { %v1105_v36 = vunpack.i.h.bf16 %v1103_v35  ;;  %v1104_v37 = vunpack.i.l.bf16 %v1103_v35 }
 0x1b9   : > { %v874_v38 = vsel %vm873_vm2, %v1104_v37, %v1105_v36 }
 0x1ba   : > { %v878_v39 = vmax.f32 %v857_v27, %v874_v38  ;;  %v1108_v40 = vpop.permute.xlu0 %1107 }
 0x1bb   : > { %v1110_v41 = vunpack.i.h.bf16 %v1108_v40  ;;  %v1109_v42 = vunpack.i.l.bf16 %v1108_v40 }
 0x1bc   : > { %v1073_v43 = vpack.c.bf16 %v878_v39, %v878_v39 }
 0x1bd   : > { %v875_v44 = vsel %vm873_vm2, %v1109_v42, %v1110_v41 }
 0x1be   : > { %889 = vst.msk [vmem:[%s217_s6] sm:$0xf] %vm888_vm3, %v1073_v43  ;;  %v879_v45 = vmax.f32 %v859_v31, %v875_v44 }
 0x1c0   : > { %v1074_v46 = vpack.c.bf16 %v879_v45, %v879_v45 }
 0x1c2   : > { %891 = vst.msk [vmem:[%s217_s6 + $0x4] sm:$0x7] %vm890_vm4, %v1074_v46 }
 0x1c3 PF: > { %s14_s15 = sadd.s32 1, %s1193_s15  }
 0x1c4   : > { %p11_p4 = scmp.ge.s32.totalorder %s14_s15, 4  }
 0x1c6   :  { %13 = sbr.rel (!%p11_p4) target bundleno = 1 (0x1), region = 71 }

// kernel: net_forward.7
= control target key start
LH: loop header
LB: loop body
LE: loop exit
PB: predicated region body
PF: predicated region fallthrough
CT: control target
= control target key end

     0   :  { %s1067_s15 = smov 0   ;;  %s1245_s0 = inlined_call_operand.vmem [shape: bf16[2,7,112], index: 0, kind: input, shape index: {}]   ;;  %s1246_s1 = inlined_call_operand.vmem [shape: bf16[2,7,112], index: 1, kind: input, shape index: {}]   ;;  %s1247_s2 = inlined_call_operand.vmem [shape: bf16[3,112,192], index: 2, kind: input, shape index: {}]   ;;  %s1248_s3 = inlined_call_operand.vmem [shape: f32[1,192], index: 3, kind: input, shape index: {}]   ;;  %s1249_s4 = inlined_call_operand.vmem [shape: bf16[2,6,96], index: 4, kind: output, shape index: {}]  }
   0x1 LB: > { %s848_s16 = sadd.s32 4294967295, %s1038_s15   ;;  %p852_p0 = scmp.ge.s32.totalorder %s1038_s15, 1  ;;  %s1038_s15 = sphi %s1067_s15, %s14_s15  }
   0x2   : > { %p170_p1 = scmp.lt.s32.totalorder %s1038_s15, 3 }
   0x4   : > { %p171_p2 = pnand %p852_p0, %p170_p1 }
   0x5   : > { %v967_v0 = vld [vmem:[%s1247_s2 + $0x74] ss:$8 sps:$4 sm:$0xff] (!%p171_p2)   ;;  %p198_p3 = scmp.lt.s32.totalorder (!%p171_p2), %s848_s16, 1  ;;  %v969_v1 = vld [vmem:[%s1247_s2 + $0x70] ss:$8 sps:$4 sm:$0xff] (!%p171_p2)   ;;  %v1040_v2 = vmov (!%p171_p2), 0   ;;  %v756_v55 = vlaneseq (!%p171_p2) }
   0x6   : > { %174 = sbr.rel (%p171_p2) target bundleno = 435 (0x1b3), region = 36  ;;  %365 = vmatprep.mubr.bf16.mxu0 (!%p171_p2), %v1040_v2  ;;  %646 = vmatprep.mubr.bf16.mxu1 (!%p171_p2), %v1040_v2  ;;  %v970_v3 = vld [vmem:[%s1247_s2 + $0x84] ss:$8 sps:$4 sm:$0xff] (!%p171_p2)   ;;  %v972_v4 = vld [vmem:[%s1247_s2 + $0x80] ss:$8 sps:$4 sm:$0xff] (!%p171_p2)   ;;  %vm329_vm0 = vcmask (!%p171_p2), 916480  }
   0x7   : > { %333 = vmatprep.subr.bf16.mxu0 (!%p171_p2), %v967_v0  ;;  %614 = vmatprep.subr.bf16.mxu1 (!%p171_p2), %v967_v0  ;;  %v973_v5 = vld [vmem:[%s1247_s2 + $0x94] ss:$8 sps:$4 sm:$0xff] (!%p171_p2)   ;;  %v975_v6 = vld [vmem:[%s1247_s2 + $0x90] ss:$8 sps:$4 sm:$0xff] (!%p171_p2)   ;;  %v976_v7 = vld [vmem:[%s1247_s2 + $0xa4] ss:$8 sps:$4 sm:$0xff] (!%p171_p2)  }
   0x8   : > { %334 = vmatpush1.bf16.msra.mxu0 (!%p171_p2), %v969_v1  ;;  %615 = vmatpush1.bf16.msra.mxu1 (!%p171_p2), %v969_v1  ;;  %v978_v8 = vld [vmem:[%s1247_s2 + $0xa0] ss:$8 sps:$4 sm:$0xff] (!%p171_p2)   ;;  %v979_v9 = vld [vmem:[%s1247_s2 + $0xb4] ss:$8 sps:$4 sm:$0xff] (!%p171_p2)   ;;  %v981_v11 = vld [vmem:[%s1247_s2 + $0xb0] ss:$8 sps:$4 sm:$0xff] (!%p171_p2)  }
   0x9   : > { %335 = vmatprep.subr.bf16.mxu0 (!%p171_p2), %v970_v3  ;;  %616 = vmatprep.subr.bf16.mxu1 (!%p171_p2), %v970_v3  ;;  %v982_v12 = vld [vmem:[%s1247_s2 + $0xc4] ss:$8 sps:$4 sm:$0xff] (!%p171_p2)   ;;  %v984_v14 = vld [vmem:[%s1247_s2 + $0xc0] ss:$8 sps:$4 sm:$0xff] (!%p171_p2)   ;;  %v985_v15 = vld [vmem:[%s1247_s2 + $0xd4] ss:$8 sps:$4 sm:$0xff] (!%p171_p2)  }
   0xa   : > { %v987_v18 = vld [vmem:[%s1247_s2 + $0xd0] ss:$8 sps:$4 sm:$0xff] (!%p171_p2)   ;;  %v990_v19 = vld [vmem:[%s1247_s2 + $0x4] ss:$8 sps:$4 sm:$0xff] (!%p171_p2)   ;;  %v988_v21 = vld [vmem:[%s1247_s2] ss:$8 sps:$4 sm:$0xff] (!%p171_p2)  }
   0xb   : > { %v995_v23 = vld [vmem:[%s1247_s2 + $0x14] ss:$8 sps:$4 sm:$0xff] (!%p171_p2)   ;;  %v993_v24 = vld [vmem:[%s1247_s2 + $0x10] ss:$8 sps:$4 sm:$0xff] (!%p171_p2)   ;;  %v998_v25 = vld [vmem:[%s1247_s2 + $0x24] ss:$8 sps:$4 sm:$0xff] (!%p171_p2)  }
   0xc   : > { %336 = vmatpush1.bf16.msra.mxu0 (!%p171_p2), %v972_v4  ;;  %617 = vmatpush1.bf16.msra.mxu1 (!%p171_p2), %v972_v4  ;;  %v996_v26 = vld [vmem:[%s1247_s2 + $0x20] ss:$8 sps:$4 sm:$0xff] (!%p171_p2)   ;;  %v1001_v27 = vld [vmem:[%s1247_s2 + $0x34] ss:$8 sps:$4 sm:$0xff] (!%p171_p2)   ;;  %v999_v28 = vld [vmem:[%s1247_s2 + $0x30] ss:$8 sps:$4 sm:$0xff] (!%p171_p2)  }
   0xd   : > { %s1251_s16 = smov (!%p198_p3, %s848_s16), 1  ;;  %337 = vmatprep.subr.bf16.mxu0 %v973_v5  ;;  %618 = vmatprep.subr.bf16.mxu1 %v973_v5  ;;  %v1004_v29 = vld [vmem:[%s1247_s2 + $0x44] ss:$8 sps:$4 sm:$0xff]   ;;  %v1002_v30 = vld [vmem:[%s1247_s2 + $0x40] ss:$8 sps:$4 sm:$0xff]   ;;  %v757_v56 = vshrl.u32 %v756_v55, 7 }
   0xe   : > { %s1092_s27 = sshll.u32 %s1251_s16, 2  ;;  %v1007_v31 = vld [vmem:[%s1247_s2 + $0x54] ss:$8 sps:$4 sm:$0xff]   ;;  %v1005_v32 = vld [vmem:[%s1247_s2 + $0x50] ss:$8 sps:$4 sm:$0xff]   ;;  %s1041_s17 = smov 32  }
   0xf   : > { %s1104_s8 = scalar_lea.vmem %s1245_s0, %s1092_s27  ;;  %s1110_s11 = scalar_lea.vmem %s1246_s1, %s1092_s27  ;;  %v1010_v33 = vld [vmem:[%s1247_s2 + $0x64] ss:$8 sps:$4 sm:$0xff]   ;;  %v1008_v34 = vld [vmem:[%s1247_s2 + $0x60] ss:$8 sps:$4 sm:$0xff]   ;;  %v1016_v38 = vld [vmem:[%s1247_s2 + $0xf4] ss:$8 sps:$4 sm:$0xff]  }
  0x10   : > { %338 = vmatpush1.bf16.msra.mxu0 %v975_v6  ;;  %619 = vmatpush1.bf16.msra.mxu1 %v975_v6  ;;  %v991_v10 = vld [vmem:[%s1104_s8] ss:$0 sps:$4 sm:$0xff]   ;;  %v1013_v35 = vld [vmem:[%s1247_s2 + $0xe4] ss:$8 sps:$4 sm:$0xff]   ;;  %v1014_v39 = vld [vmem:[%s1247_s2 + $0xf0] ss:$8 sps:$4 sm:$0xff]  }
  0x11   : > { %339 = vmatprep.subr.bf16.mxu0 %v976_v7  ;;  %620 = vmatprep.subr.bf16.mxu1 %v976_v7  ;;  %v494_v13 = vshll.u32 %v991_v10, 16  ;;  %v492_v16 = vshrl.u32 %v991_v10, 16  ;;  %v257_v22 = vld [vmem:[%s1110_s11] sm:$0x7]  ;;  %v1019_v40 = vld [vmem:[%s1247_s2 + $0x104] ss:$8 sps:$4 sm:$0xff]  }
  0x12   : > { %v1011_v36 = vld [vmem:[%s1247_s2 + $0xe0] ss:$8 sps:$4 sm:$0xff]   ;;  %v1022_v42 = vld [vmem:[%s1247_s2 + $0x114] ss:$8 sps:$4 sm:$0xff]   ;;  %v1020_v43 = vld [vmem:[%s1247_s2 + $0x110] ss:$8 sps:$4 sm:$0xff]  }
  0x13   : > { %v496_v17 = vrot.slane %v494_v13, 1  ;;  %v255_v37 = vld [vmem:[%s1104_s8] sm:$0x7]  ;;  %v1025_v44 = vld [vmem:[%s1247_s2 + $0x124] ss:$8 sps:$4 sm:$0xff]   ;;  %v758_v57 = vsub.s32 0, %v757_v56  ;;  %s209_s8 = scalar_lea.vmem %s1249_s4, %s1092_s27 }
  0x14   : > { %340 = vmatpush1.bf16.msra.mxu0 %v978_v8  ;;  %621 = vmatpush1.bf16.msra.mxu1 %v978_v8  ;;  %v1017_v41 = vld [vmem:[%s1247_s2 + $0x100] ss:$8 sps:$4 sm:$0xff]   ;;  %v1028_v47 = vld [vmem:[%s1247_s2 + $0x134] ss:$8 sps:$4 sm:$0xff]   ;;  %v1026_v49 = vld [vmem:[%s1247_s2 + $0x130] ss:$8 sps:$4 sm:$0xff]  }
  0x15   : > { %341 = vmatprep.subr.bf16.mxu0 %v979_v9  ;;  %622 = vmatprep.subr.bf16.mxu1 %v979_v9  ;;  %v1137_v20 = vor.u32 %v496_v17, %v492_v16  ;;  %v992_v45 = vld [vmem:[%s1110_s11] ss:$0 sps:$4 sm:$0xff]   ;;  %v1031_v50 = vld [vmem:[%s1247_s2 + $0x144] ss:$8 sps:$4 sm:$0xff]   ;;  %v762_v59 = vsub.s32 1, %v757_v56  ;;  %vm776_vm1 = vcmask 261120  }
  0x16   : > { %v1023_v46 = vld [vmem:[%s1247_s2 + $0x120] ss:$8 sps:$4 sm:$0xff]   ;;  %v702_v48 = vshll.u32 %v992_v45, 16  ;;  %v700_v51 = vshrl.u32 %v992_v45, 16  ;;  %vm781_vm2 = vcmask 780288  }
  0x17   : > { %v1029_v53 = vld [vmem:[%s1247_s2 + $0x140] ss:$8 sps:$4 sm:$0xff]  }
  0x18   : > { %342 = vmatpush1.bf16.msra.mxu0 %v981_v11  ;;  %623 = vmatpush1.bf16.msra.mxu1 %v981_v11  ;;  %v704_v52 = vrot.slane %v702_v48, 1  ;;  %v754_v58 = vld [vmem:[%s1248_s3] sm:$0x3] }
  0x19   : > { %343 = vmatprep.subr.bf16.mxu0 %v982_v12  ;;  %624 = vmatprep.subr.bf16.mxu1 %v982_v12  ;;  %v759_v60 = vrot.slane %v754_v58, %v758_v57  ;;  %v763_v63 = vrot.slane %v754_v58, %v762_v59 }
  0x1a   : > { %v705_v54 = vor.u32 %v704_v52, %v700_v51 }
  0x1c   : > { %344 = vmatpush1.bf16.msra.mxu0 %v984_v14  ;;  %625 = vmatpush1.bf16.msra.mxu1 %v984_v14 }
  0x1d   : > { %345 = vmatprep.subr.bf16.mxu0 %v985_v15  ;;  %626 = vmatprep.subr.bf16.mxu1 %v985_v15 }
  0x20   : > { %346 = vmatpush1.bf16.msra.mxu0 %v987_v18  ;;  %627 = vmatpush1.bf16.msra.mxu1 %v987_v18 }
  0x21   : > { %447 = vmatprep.subr.bf16.mxu0 %v990_v19  ;;  %655 = vmatprep.subr.bf16.mxu1 %v990_v19 }
  0x23   : > { %898 = vmatmul.mubr.msk.bf16.vlgmr.msra.gmra.mrb[0].mxu0 %vm329_vm0, %v257_v22  ;;  %930 = vmatmul.mubr.msk.bf16.vlgmr.msra.gmra.mrb[0].mxu1 %vm329_vm0, %v1137_v20 }
  0x24   : > { %448 = vmatpush1.bf16.msra.mxu0 %v988_v21  ;;  %656 = vmatpush1.bf16.msra.mxu1 %v988_v21 }
  0x25   : > { %449 = vmatprep.subr.bf16.mxu0 %v995_v23  ;;  %657 = vmatprep.subr.bf16.mxu1 %v995_v23 }
  0x26   : > { %479 = vmatprep.mubr.bf16.mxu0 %v1040_v2  ;;  %687 = vmatprep.mubr.bf16.mxu1 %v1040_v2 }
  0x28   : > { %450 = vmatpush1.bf16.msra.mxu0 %v993_v24  ;;  %658 = vmatpush1.bf16.msra.mxu1 %v993_v24 }
  0x29   : > { %451 = vmatprep.subr.bf16.mxu0 %v998_v25  ;;  %659 = vmatprep.subr.bf16.mxu1 %v998_v25 }
  0x2c   : > { %452 = vmatpush1.bf16.msra.mxu0 %v996_v26  ;;  %660 = vmatpush1.bf16.msra.mxu1 %v996_v26 }
  0x2d   : > { %453 = vmatprep.subr.bf16.mxu0 %v1001_v27  ;;  %661 = vmatprep.subr.bf16.mxu1 %v1001_v27 }
  0x30   : > { %454 = vmatpush1.bf16.msra.mxu0 %v999_v28  ;;  %662 = vmatpush1.bf16.msra.mxu1 %v999_v28 }
  0x31   : > { %455 = vmatprep.subr.bf16.mxu0 %v1004_v29  ;;  %663 = vmatprep.subr.bf16.mxu1 %v1004_v29 }
  0x34   : > { %456 = vmatpush1.bf16.msra.mxu0 %v1002_v30  ;;  %664 = vmatpush1.bf16.msra.mxu1 %v1002_v30 }
  0x35   : > { %457 = vmatprep.subr.bf16.mxu0 %v1007_v31  ;;  %665 = vmatprep.subr.bf16.mxu1 %v1007_v31 }
  0x38   : > { %458 = vmatpush1.bf16.msra.mxu0 %v1005_v32  ;;  %666 = vmatpush1.bf16.msra.mxu1 %v1005_v32 }
  0x39   : > { %459 = vmatprep.subr.bf16.mxu0 %v1010_v33  ;;  %667 = vmatprep.subr.bf16.mxu1 %v1010_v33 }
  0x3c   : > { %460 = vmatpush1.bf16.msra.mxu0 %v1008_v34  ;;  %668 = vmatpush1.bf16.msra.mxu1 %v1008_v34 }
  0x3d   : > { %571 = vmatprep.subr.bf16.mxu0 %v1013_v35  ;;  %709 = vmatprep.subr.bf16.mxu1 %v1013_v35 }
  0x3f   : > { %913 = vmatmul.mubr.msk.bf16.vlgmr.msra.gmra.mrb[0].mxu0 %vm329_vm0, %v255_v37  ;;  %931 = vmatmul.mubr.msk.bf16.vlgmr.msra.gmra.mrb[0].mxu1 %vm329_vm0, %v257_v22 }
  0x40   : > { %572 = vmatpush1.bf16.msra.mxu0 %v1011_v36  ;;  %710 = vmatpush1.bf16.msra.mxu1 %v1011_v36 }
  0x41   : > { %573 = vmatprep.subr.bf16.mxu0 %v1016_v38  ;;  %711 = vmatprep.subr.bf16.mxu1 %v1016_v38 }
  0x42   : > { %603 = vmatprep.mubr.bf16.mxu0 %v1040_v2  ;;  %741 = vmatprep.mubr.bf16.mxu1 %v1040_v2 }
  0x44   : > { %574 = vmatpush1.bf16.msra.mxu0 %v1014_v39  ;;  %712 = vmatpush1.bf16.msra.mxu1 %v1014_v39 }
  0x45   : > { %575 = vmatprep.subr.bf16.mxu0 %v1019_v40  ;;  %713 = vmatprep.subr.bf16.mxu1 %v1019_v40 }
  0x48   : > { %576 = vmatpush1.bf16.msra.mxu0 %v1017_v41  ;;  %714 = vmatpush1.bf16.msra.mxu1 %v1017_v41 }
  0x49   : > { %577 = vmatprep.subr.bf16.mxu0 %v1022_v42  ;;  %715 = vmatprep.subr.bf16.mxu1 %v1022_v42 }
  0x4c   : > { %578 = vmatpush1.bf16.msra.mxu0 %v1020_v43  ;;  %716 = vmatpush1.bf16.msra.mxu1 %v1020_v43 }
  0x4d   : > { %579 = vmatprep.subr.bf16.mxu0 %v1025_v44  ;;  %717 = vmatprep.subr.bf16.mxu1 %v1025_v44 }
  0x50   : > { %580 = vmatpush1.bf16.msra.mxu0 %v1023_v46  ;;  %718 = vmatpush1.bf16.msra.mxu1 %v1023_v46 }
  0x51   : > { %581 = vmatprep.subr.bf16.mxu0 %v1028_v47  ;;  %719 = vmatprep.subr.bf16.mxu1 %v1028_v47 }
  0x54   : > { %582 = vmatpush1.bf16.msra.mxu0 %v1026_v49  ;;  %720 = vmatpush1.bf16.msra.mxu1 %v1026_v49 }
  0x55   : > { %583 = vmatprep.subr.bf16.mxu0 %v1031_v50  ;;  %721 = vmatprep.subr.bf16.mxu1 %v1031_v50 }
  0x58   : > { %584 = vmatpush1.bf16.msra.mxu0 %v1029_v53  ;;  %722 = vmatpush1.bf16.msra.mxu1 %v1029_v53 }
  0x5b   : > { %929 = vmatmul.mubr.msk.bf16.vlgmr.msra.gmra.mrb[0].mxu0 %vm329_vm0, %v1137_v20  ;;  %933 = vmatmul.mubr.msk.bf16.vlgmr.msra.gmra.mrb[0].mxu1 %vm329_vm0, %v705_v54 }
 0x12e   : > { %v605_v61 = vpop.f32.mrb[0].mxu0  ;;  %v743_v62 = vpop.f32.mrb[0].mxu1 }
 0x12f   : > { %v752_v0 = vmax.f32 %v605_v61, %v743_v62  ;;  %v607_v1 = vpop.f32.mrb[1].mxu0  ;;  %v745_v2 = vpop.f32.mrb[1].mxu1 }
 0x130   : > { %v753_v3 = vmax.f32 %v607_v1, %v745_v2  ;;  %v609_v4 = vpop.f32.mrb[2].mxu0  ;;  %v747_v5 = vpop.f32.mrb[2].mxu1 }
 0x131   : > { %v766_v6 = vadd.f32 %v759_v60, %v752_v0  ;;  %v610_v7 = vpop.f32.mrb[3].mxu0  ;;  %v748_v8 = vpop.f32.mrb[3].mxu1 }
 0x132   : > { %v767_v9 = vadd.f32 %v763_v63, %v753_v3 }
 0x133   : > { %v768_v10 = vmax.f32 %v766_v6, 0.0 }
 0x134   : > { %v769_v11 = vmax.f32 %v767_v9, 0.0 }
 0x136   : > { %v962_v12 = vpack.i.bf16 %v769_v11, %v768_v10 }
 0x138   : > { %963 = vrot.lane.b32.xlu0 %v962_v12, %s1041_s17 }
 0x1aa   : > { %v964_v13 = vpop.permute.xlu0 %963 }
 0x1ab   : > { %v966_v14 = vunpack.i.h.bf16 %v964_v13  ;;  %v965_v15 = vunpack.i.l.bf16 %v964_v13 }
 0x1ad   : > { %v777_v16 = vsel %vm776_vm1, %v965_v15, %v966_v14 }
 0x1ae   : > { %v779_v17 = vmax.f32 %v768_v10, %v777_v16 }
 0x1b0   : > { %v780_v18 = vpack.c.bf16 %v779_v17, %v779_v17 }
 0x1b2   : > { %782 = vst.msk [vmem:[%s209_s8] sm:$0x7] %vm781_vm2, %v780_v18 }
 0x1b3 PF: > { %s14_s15 = sadd.s32 1, %s1038_s15  }
 0x1b4   : > { %p11_p4 = scmp.ge.s32.totalorder %s14_s15, 4  }
 0x1b6   :  { %13 = sbr.rel (!%p11_p4) target bundleno = 1 (0x1), region = 71 }

// kernel: net_forward.8
= control target key start
LH: loop header
LB: loop body
LE: loop exit
PB: predicated region body
PF: predicated region fallthrough
CT: control target
= control target key end

     0   :  { %s1000_s15 = smov 0   ;;  %s1147_s0 = inlined_call_operand.vmem [shape: bf16[2,3,96], index: 0, kind: input, shape index: {}]   ;;  %s1148_s1 = inlined_call_operand.vmem [shape: bf16[2,3,96], index: 1, kind: input, shape index: {}]   ;;  %s1149_s2 = inlined_call_operand.vmem [shape: bf16[3,96,128], index: 2, kind: input, shape index: {}]   ;;  %s1150_s3 = inlined_call_operand.vmem [shape: f32[1,128], index: 3, kind: input, shape index: {}]   ;;  %s1151_s4 = inlined_call_operand.vmem [shape: bf16[2,2,64], index: 4, kind: output, shape index: {}]  }
   0x1 LB: > { %s721_s16 = sadd.s32 4294967295, %s970_s15   ;;  %p725_p0 = scmp.ge.s32.totalorder %s970_s15, 1  ;;  %s970_s15 = sphi %s1000_s15, %s14_s15  }
   0x2   : > { %p170_p1 = scmp.lt.s32.totalorder %s970_s15, 3 }
   0x4   : > { %p171_p2 = pnand %p725_p0, %p170_p1 }
   0x5   : > { %v946_v0 = vld [vmem:[%s1149_s2 + $0x30] sm:$0xff] (!%p171_p2)   ;;  %v972_v1 = vmov (!%p171_p2), 0.0   ;;  %v947_v2 = vld [vmem:[%s1149_s2 + $0x38] sm:$0xff] (!%p171_p2)   ;;  %p197_p3 = scmp.lt.s32.totalorder (!%p171_p2), %s721_s16, 1  ;;  %vm973_vm0 = vmmov (!%p171_p2), 0   ;;  %v948_v3 = vld [vmem:[%s1149_s2 + $0x40] sm:$0xff] (!%p171_p2)  }
   0x6   : > { %174 = sbr.rel (%p171_p2) target bundleno = 416 (0x1a0), region = 36  ;;  %823 = vmatprep.subr.bf16.mxu0 (!%p171_p2), %v972_v1  ;;  %871 = vmatprep.subr.bf16.mxu1 (!%p171_p2), %v972_v1  ;;  %v949_v5 = vld [vmem:[%s1149_s2 + $0x48] sm:$0xff] (!%p171_p2)   ;;  %v950_v7 = vld [vmem:[%s1149_s2 + $0x50] sm:$0xff] (!%p171_p2)   ;;  %v951_v10 = vld [vmem:[%s1149_s2 + $0x58] sm:$0xff] (!%p171_p2)   ;;  %vm287_vm1 = vcmask (!%p171_p2), 785408   ;;  %s974_s12 = smov (!%p171_p2), 64  }
   0x7   : > { %824 = vmatpush3.bf16.msra.mxu0 (!%p171_p2), %v946_v0  ;;  %872 = vmatpush3.bf16.msra.mxu1 (!%p171_p2), %v946_v0  ;;  %v952_v13 = vld [vmem:[%s1149_s2] sm:$0xff] (!%p171_p2)   ;;  %v953_v14 = vld [vmem:[%s1149_s2 + $0x8] sm:$0xff] (!%p171_p2)   ;;  %v954_v15 = vld [vmem:[%s1149_s2 + $0x10] sm:$0xff] (!%p171_p2)   ;;  %vm660_vm2 = vcmask (!%p171_p2), 516096  }
   0x8   : > { %825 = vmatprep.subr.bf16.mxu0 (!%p171_p2), %v972_v1  ;;  %873 = vmatprep.subr.bf16.mxu1 (!%p171_p2), %v972_v1  ;;  %v955_v16 = vld [vmem:[%s1149_s2 + $0x18] sm:$0xff] (!%p171_p2)   ;;  %v956_v17 = vld [vmem:[%s1149_s2 + $0x20] sm:$0xff] (!%p171_p2)   ;;  %v957_v18 = vld [vmem:[%s1149_s2 + $0x28] sm:$0xff] (!%p171_p2)  }
   0x9   : > { %835 = vmatprep.mubr.msk.bf16.mxu0 (!%p171_p2), %vm973_vm0, %v972_v1  ;;  %883 = vmatprep.mubr.msk.bf16.mxu1 (!%p171_p2), %vm973_vm0, %v972_v1  ;;  %v958_v20 = vld [vmem:[%s1149_s2 + $0x60] sm:$0xff] (!%p171_p2)   ;;  %v959_v21 = vld [vmem:[%s1149_s2 + $0x68] sm:$0xff] (!%p171_p2)   ;;  %v960_v22 = vld [vmem:[%s1149_s2 + $0x70] sm:$0xff] (!%p171_p2)  }
   0xa   : > { %v961_v24 = vld [vmem:[%s1149_s2 + $0x78] sm:$0xff] (!%p171_p2)   ;;  %v962_v26 = vld [vmem:[%s1149_s2 + $0x80] sm:$0xff] (!%p171_p2)   ;;  %v963_v29 = vld [vmem:[%s1149_s2 + $0x88] sm:$0xff] (!%p171_p2)  }
   0xb   : > { %826 = vmatpush3.bf16.msra.mxu0 (!%p171_p2), %v947_v2  ;;  %874 = vmatpush3.bf16.msra.mxu1 (!%p171_p2), %v947_v2  ;;  %v778_v33 = vld [vmem:[%s1150_s3] ss:$0 sm:$0xff] (!%p171_p2) }
   0xc   : > { %827 = vmatprep.subr.bf16.mxu0 (!%p171_p2), %v972_v1  ;;  %875 = vmatprep.subr.bf16.mxu1 (!%p171_p2), %v972_v1 }
   0xd   : > { %s1153_s16 = smov (!%p197_p3, %s721_s16), 1 }
   0xe   : > { %s726_s23 = sshll.u32 %s1153_s16, 1  ;;  %s207_s17 = scalar_lea.vmem %s1151_s4, %s1153_s16 }
   0xf   : > { %s1033_s26 = scalar_lea.vmem %s1147_s0, %s726_s23  ;;  %828 = vmatpush3.bf16.msra.mxu0 %v948_v3  ;;  %876 = vmatpush3.bf16.msra.mxu1 %v948_v3  ;;  %s1054_s9 = scalar_lea.vmem %s1148_s1, %s726_s23 }
  0x10   : > { %v766_v4 = vld.sshfl [vmem:[%s1033_s26] sm:$0x3 pattern:$0x76325410]  ;;  %829 = vmatprep.subr.bf16.mxu0 %v972_v1  ;;  %877 = vmatprep.subr.bf16.mxu1 %v972_v1 }
  0x11   : > { %v421_v6 = vshll.u32 %v766_v4, 16  ;;  %v419_v8 = vshrl.u32 %v766_v4, 16  ;;  %v249_v12 = vld [vmem:[%s1054_s9] sm:$0x1] }
  0x12   : > { %v247_v19 = vld [vmem:[%s1033_s26] sm:$0x1] }
  0x13   : > { %830 = vmatpush3.bf16.msra.mxu0 %v949_v5  ;;  %878 = vmatpush3.bf16.msra.mxu1 %v949_v5  ;;  %v423_v9 = vrot.slane %v421_v6, 1  ;;  %v776_v23 = vld.sshfl [vmem:[%s1054_s9] sm:$0x3 pattern:$0x76325410] }
  0x14   : > { %831 = vmatprep.subr.bf16.mxu0 %v972_v1  ;;  %879 = vmatprep.subr.bf16.mxu1 %v972_v1  ;;  %v596_v25 = vshll.u32 %v776_v23, 16  ;;  %v594_v27 = vshrl.u32 %v776_v23, 16 }
  0x15   : > { %v1056_v11 = vor.u32 %v423_v9, %v419_v8 }
  0x16   : > { %v598_v28 = vrot.slane %v596_v25, 1 }
  0x17   : > { %832 = vmatpush3.bf16.msra.mxu0 %v950_v7  ;;  %880 = vmatpush3.bf16.msra.mxu1 %v950_v7 }
  0x18   : > { %833 = vmatprep.subr.bf16.mxu0 %v972_v1  ;;  %881 = vmatprep.subr.bf16.mxu1 %v972_v1  ;;  %v599_v30 = vor.u32 %v598_v28, %v594_v27 }
  0x1b   : > { %834 = vmatpush3.bf16.msra.mxu0 %v951_v10  ;;  %882 = vmatpush3.bf16.msra.mxu1 %v951_v10 }
  0x1c   : > { %839 = vmatprep.subr.bf16.mxu0 %v972_v1  ;;  %887 = vmatprep.subr.bf16.mxu1 %v972_v1 }
  0x1e   : > { %836 = vmatmul.mubr.msk.bf16.vlgmr.msra.gmra.mrb[0].mxu0 %vm287_vm1, %v249_v12  ;;  %884 = vmatmul.mubr.msk.bf16.vlgmr.msra.gmra.mrb[0].mxu1 %vm287_vm1, %v1056_v11 }
  0x1f   : > { %840 = vmatpush3.bf16.msra.mxu0 %v952_v13  ;;  %888 = vmatpush3.bf16.msra.mxu1 %v952_v13 }
  0x20   : > { %841 = vmatprep.subr.bf16.mxu0 %v972_v1  ;;  %889 = vmatprep.subr.bf16.mxu1 %v972_v1 }
  0x21   : > { %851 = vmatprep.mubr.msk.bf16.mxu0 %vm973_vm0, %v972_v1  ;;  %899 = vmatprep.mubr.msk.bf16.mxu1 %vm973_vm0, %v972_v1 }
  0x23   : > { %842 = vmatpush3.bf16.msra.mxu0 %v953_v14  ;;  %890 = vmatpush3.bf16.msra.mxu1 %v953_v14 }
  0x24   : > { %843 = vmatprep.subr.bf16.mxu0 %v972_v1  ;;  %891 = vmatprep.subr.bf16.mxu1 %v972_v1 }
  0x27   : > { %844 = vmatpush3.bf16.msra.mxu0 %v954_v15  ;;  %892 = vmatpush3.bf16.msra.mxu1 %v954_v15 }
  0x28   : > { %845 = vmatprep.subr.bf16.mxu0 %v972_v1  ;;  %893 = vmatprep.subr.bf16.mxu1 %v972_v1 }
  0x2b   : > { %846 = vmatpush3.bf16.msra.mxu0 %v955_v16  ;;  %894 = vmatpush3.bf16.msra.mxu1 %v955_v16 }
  0x2c   : > { %847 = vmatprep.subr.bf16.mxu0 %v972_v1  ;;  %895 = vmatprep.subr.bf16.mxu1 %v972_v1 }
  0x2f   : > { %848 = vmatpush3.bf16.msra.mxu0 %v956_v17  ;;  %896 = vmatpush3.bf16.msra.mxu1 %v956_v17 }
  0x30   : > { %849 = vmatprep.subr.bf16.mxu0 %v972_v1  ;;  %897 = vmatprep.subr.bf16.mxu1 %v972_v1 }
  0x33   : > { %850 = vmatpush3.bf16.msra.mxu0 %v957_v18  ;;  %898 = vmatpush3.bf16.msra.mxu1 %v957_v18 }
  0x34   : > { %855 = vmatprep.subr.bf16.mxu0 %v972_v1  ;;  %903 = vmatprep.subr.bf16.mxu1 %v972_v1 }
  0x36   : > { %852 = vmatmul.mubr.msk.bf16.vlgmr.msra.gmra.mrb[0].mxu0 %vm287_vm1, %v247_v19  ;;  %900 = vmatmul.mubr.msk.bf16.vlgmr.msra.gmra.mrb[0].mxu1 %vm287_vm1, %v249_v12 }
  0x37   : > { %856 = vmatpush3.bf16.msra.mxu0 %v958_v20  ;;  %904 = vmatpush3.bf16.msra.mxu1 %v958_v20 }
  0x38   : > { %857 = vmatprep.subr.bf16.mxu0 %v972_v1  ;;  %905 = vmatprep.subr.bf16.mxu1 %v972_v1 }
  0x39   : > { %867 = vmatprep.mubr.msk.bf16.mxu0 %vm973_vm0, %v972_v1  ;;  %915 = vmatprep.mubr.msk.bf16.mxu1 %vm973_vm0, %v972_v1 }
  0x3b   : > { %858 = vmatpush3.bf16.msra.mxu0 %v959_v21  ;;  %906 = vmatpush3.bf16.msra.mxu1 %v959_v21 }
  0x3c   : > { %859 = vmatprep.subr.bf16.mxu0 %v972_v1  ;;  %907 = vmatprep.subr.bf16.mxu1 %v972_v1 }
  0x3f   : > { %860 = vmatpush3.bf16.msra.mxu0 %v960_v22  ;;  %908 = vmatpush3.bf16.msra.mxu1 %v960_v22 }
  0x40   : > { %861 = vmatprep.subr.bf16.mxu0 %v972_v1  ;;  %909 = vmatprep.subr.bf16.mxu1 %v972_v1 }
  0x43   : > { %862 = vmatpush3.bf16.msra.mxu0 %v961_v24  ;;  %910 = vmatpush3.bf16.msra.mxu1 %v961_v24 }
  0x44   : > { %863 = vmatprep.subr.bf16.mxu0 %v972_v1  ;;  %911 = vmatprep.subr.bf16.mxu1 %v972_v1 }
  0x47   : > { %864 = vmatpush3.bf16.msra.mxu0 %v962_v26  ;;  %912 = vmatpush3.bf16.msra.mxu1 %v962_v26 }
  0x48   : > { %865 = vmatprep.subr.bf16.mxu0 %v972_v1  ;;  %913 = vmatprep.subr.bf16.mxu1 %v972_v1 }
  0x4b   : > { %866 = vmatpush3.bf16.msra.mxu0 %v963_v29  ;;  %914 = vmatpush3.bf16.msra.mxu1 %v963_v29 }
  0x4e   : > { %868 = vmatmul.mubr.msk.bf16.vlgmr.msra.gmra.mrb[0].mxu0 %vm287_vm1, %v1056_v11  ;;  %916 = vmatmul.mubr.msk.bf16.vlgmr.msra.gmra.mrb[0].mxu1 %vm287_vm1, %v599_v30 }
 0x121   : > { %v498_v31 = vpop.f32.mrb[0].mxu0  ;;  %v637_v32 = vpop.f32.mrb[0].mxu1 }
 0x122   : > { %v644_v34 = vmax.f32 %v498_v31, %v637_v32  ;;  %v869_v35 = vpop.f32.mrb[1].mxu0  ;;  %v917_v36 = vpop.f32.mrb[1].mxu1 }
 0x123   : > { %v501_v37 = vpop.f32.mrb[2].mxu0  ;;  %v640_v38 = vpop.f32.mrb[2].mxu1 }
 0x124   : > { %v870_v39 = vpop.f32.mrb[3].mxu0  ;;  %v918_v40 = vpop.f32.mrb[3].mxu1  ;;  %v652_v41 = vadd.f32 %v778_v33, %v644_v34 }
 0x126   : > { %v653_v42 = vmax.f32 %v652_v41, 0.0 }
 0x128   : > { %655 = vrot.lane.b32.xlu0 %v653_v42, %s974_s12 }
 0x19a   : > { %v656_v43 = vpop.permute.xlu0 %655 }
 0x19b   : > { %v658_v44 = vmax.f32 %v653_v42, %v656_v43 }
 0x19d   : > { %v659_v45 = vpack.c.bf16 %v658_v44, %v658_v44 }
 0x19f   : > { %661 = vst.msk [vmem:[%s207_s17] sm:$0x1] %vm660_vm2, %v659_v45 }
 0x1a0 PF: > { %s14_s15 = sadd.s32 1, %s970_s15  }
 0x1a1   : > { %p11_p4 = scmp.ge.s32.totalorder %s14_s15, 4  }
 0x1a3   :  { %13 = sbr.rel (!%p11_p4) target bundleno = 1 (0x1), region = 71 }

// kernel: net_forward.9
= control target key start
LH: loop header
LB: loop body
LE: loop exit
PB: predicated region body
PF: predicated region fallthrough
CT: control target
= control target key end

     0   :  { %v371_v3 = vmov 0.0|0.0   ;;  %vm372_vm0 = vmmov 0   ;;  %v373_v6 = vmov 0.0   ;;  %s497_s0 = inlined_call_operand.vmem [shape: bf16[2,128], index: 0, kind: input, shape index: {}]   ;;  %s498_s1 = inlined_call_operand.vmem [shape: f32[2,32], index: 1, kind: input, shape index: {}]   ;;  %s499_s2 = inlined_call_operand.vmem [shape: f32[128,32], index: 2, kind: input, shape index: {}]   ;;  %s500_s3 = inlined_call_operand.vmem [shape: f32[1,32], index: 3, kind: input, shape index: {}]   ;;  %s501_s4 = inlined_call_operand.vmem [shape: f32[32,2], index: 4, kind: input, shape index: {}]   ;;  %s502_s5 = inlined_call_operand.vmem [shape: f32[1,2], index: 5, kind: input, shape index: {}]   ;;  %s503_s6 = inlined_call_operand.hbm [shape: f32[2,2], index: 6, kind: output, shape index: {}]  }
   0x1   :  { %v26_v0 = vld [vmem:[%s499_s2] sm:$0xff]  ;;  %v27_v1 = vld [vmem:[%s499_s2 + $0x8] sm:$0xff]  ;;  %v28_v2 = vld [vmem:[%s499_s2 + $0x10] sm:$0xff]  ;;  %309 = vmatprep.subr.bf16.mxu0 %v371_v3  ;;  %295 = vmatprep.mubr.msk.f32.mxu0 %vm372_vm0, %v373_v6 }
   0x2   :  { %v310_v4 = vpack.c.bf16 %v27_v1, %v26_v0  ;;  %v29_v5 = vld [vmem:[%s499_s2 + $0x18] sm:$0xff]  ;;  %333 = vmatprep.subr.bf16.mxu1 %v371_v3  ;;  %306 = vmatprep.mubr.msk.f32.mxu1 %vm372_vm0, %v373_v6  ;;  %v30_v8 = vld [vmem:[%s499_s2 + $0x20] sm:$0xff]  ;;  %v31_v9 = vld [vmem:[%s499_s2 + $0x28] sm:$0xff] }
   0x3   :  { %v313_v7 = vpack.c.bf16 %v29_v5, %v28_v2 }
   0x4   :  { %311 = vmatpush3.bf16.msra.mxu0 %v310_v4 }
   0x5   :  { %312 = vmatprep.subr.bf16.mxu0 %v371_v3 }
   0x6   :  { %11 = vsyncpa [#allocation3], 0  ;;  %v316_v10 = vpack.c.bf16 %v31_v9, %v30_v8  ;;  %v32_v11 = vld [vmem:[%s499_s2 + $0x30] sm:$0xff]  ;;  %v33_v12 = vld [vmem:[%s499_s2 + $0x38] sm:$0xff]  ;;  %vm135_vm2 = vcmask 261120   ;;  %vm209_vm3 = vcmask 9216  }
   0x7   :  { %v319_v13 = vpack.c.bf16 %v33_v12, %v32_v11  ;;  %v34_v14 = vld [vmem:[%s499_s2 + $0x40] sm:$0xff]  ;;  %v35_v15 = vld [vmem:[%s499_s2 + $0x48] sm:$0xff]  ;;  %v36_v17 = vld [vmem:[%s499_s2 + $0x50] sm:$0xff] }
   0x8   :  { %314 = vmatpush3.bf16.msra.mxu0 %v313_v7  ;;  %v322_v16 = vpack.c.bf16 %v35_v15, %v34_v14  ;;  %v37_v18 = vld [vmem:[%s499_s2 + $0x58] sm:$0xff]  ;;  %v38_v20 = vld [vmem:[%s499_s2 + $0x60] sm:$0xff]  ;;  %v39_v21 = vld [vmem:[%s499_s2 + $0x68] sm:$0xff] }
   0x9   :  { %315 = vmatprep.subr.bf16.mxu0 %v371_v3  ;;  %v325_v19 = vpack.c.bf16 %v37_v18, %v36_v17  ;;  %v328_v22 = vpack.c.bf16 %v39_v21, %v38_v20  ;;  %v40_v23 = vld [vmem:[%s499_s2 + $0x70] sm:$0xff]  ;;  %v41_v24 = vld [vmem:[%s499_s2 + $0x78] sm:$0xff]  ;;  %v24_v26 = vld [vmem:[%s497_s0] sm:$0x1] }
   0xa   :  { %v331_v25 = vpack.c.bf16 %v41_v24, %v40_v23  ;;  %v25_v27 = vunpack.c.l.bf16 %v24_v26  ;;  %v124_v28 = vld [vmem:[%s501_s4] sm:$0xff]  ;;  %v125_v29 = vld [vmem:[%s501_s4 + $0x8] sm:$0xff]  ;;  %v126_v31 = vld [vmem:[%s501_s4 + $0x10] sm:$0xff] }
   0xb   :  { %v334_v30 = vpack.c.bf16 %v125_v29, %v124_v28  ;;  %v127_v32 = vld [vmem:[%s501_s4 + $0x18] sm:$0xff]  ;;  %v238_v34 = vld [vmem:[%s500_s3] ss:$0 sm:$0xff] }
   0xc   :  { %317 = vmatpush3.bf16.msra.mxu0 %v316_v10  ;;  %v337_v33 = vpack.c.bf16 %v127_v32, %v126_v31  ;;  %v120_v38 = vld [vmem:[%s498_s1] sm:$0x3]  ;;  %s374_s1 = smov [#allocation2]  }
   0xd   :  { %318 = vmatprep.subr.bf16.mxu0 %v371_v3  ;;  %335 = vmatpush3.bf16.msra.mxu1 %v334_v30  ;;  %vm121_vm1 = vcmp.ge.f32.partialorder %v120_v38, 0.25  ;;  %v239_v42 = vld [vmem:[%s502_s5] ss:$0 sm:$0xff]  ;;  %s230_s3 = sshll.u32 %s374_s1, 4  ;;  %s231_s3 = int_to_ptr.vmem [resolvable:$true] %s230_s3 }
   0xe   :  { %336 = vmatprep.subr.bf16.mxu1 %v371_v3  ;;  %s347_s5 = scalar_lea.vmem %s231_s3, 32  ;;  %p352_p1 = scmp.lt.s32.totalorder %s231_s3, %s231_s3 }
   0xf   :  { %p348_p0 = scmp.ne.s32.totalorder %s231_s3, %s347_s5  ;;  %p353_p2 = scmp.lt.s32.totalorder %s347_s5, %s347_s5 }
  0x10   :  { %320 = vmatpush3.bf16.msra.mxu0 %v319_v13 }
  0x11   :  { %321 = vmatprep.subr.bf16.mxu0 %v371_v3  ;;  %338 = vmatpush3.bf16.msra.mxu1 %v337_v33  ;;  %p354_p3 = por %p353_p2, %p352_p1 }
  0x13   :  { %p355_p4 = pnand %p354_p3, %p348_p0 }
  0x14   :  { %323 = vmatpush3.bf16.msra.mxu0 %v322_v16 }
  0x15   :  { %324 = vmatprep.subr.bf16.mxu0 %v371_v3 }
  0x18   :  { %326 = vmatpush3.bf16.msra.mxu0 %v325_v19 }
  0x19   :  { %327 = vmatprep.subr.bf16.mxu0 %v371_v3 }
  0x1c   :  { %329 = vmatpush3.bf16.msra.mxu0 %v328_v22 }
  0x1d   :  { %330 = vmatprep.subr.bf16.mxu0 %v371_v3 }
  0x20   :  { %332 = vmatpush3.bf16.msra.mxu0 %v331_v25 }
  0x23   :  { %296 = vmatmul.mubr.f32.vlgmr.msra.gmra.mrb[0].mxu0 %v25_v27 }
  0xf6   :  { %v115_v35 = vpop.f32.mrb[0].mxu0 }
  0xf7   :  { %v116_v36 = vadd.f32 %v238_v34, %v115_v35  ;;  %v297_v37 = vpop.f32.mrb[1].mxu0 }
  0xf9   :  { %v119_v39 = vmax.f32 %v116_v36, 0.0 }
  0xfb   :  { %v122_v40 = vmul.f32 1.3333334, %v119_v39 }
  0xfd   :  { %v123_v41 = vsel %vm121_vm1, %v122_v40, 0.0 }
  0xfe   :  { %307 = vmatmul.mubr.msk.f32.vlgmr.msra.gmra.mrb[0].mxu1 %vm135_vm2, %v123_v41 }
 0x1d1   :  { %v205_v43 = vpop.f32.mrb[0].mxu1 }
 0x1d2   :  { %v206_v44 = vadd.f32 %v239_v42, %v205_v43  ;;  %v308_v45 = vpop.f32.mrb[1].mxu1 }
 0x1d4   :  { %v210_v46 = vsel %vm209_vm3, %v206_v44, -inf }
 0x1d5   :  { %211 = vmax.xlane.f32.xlu0 %v210_v46 }
 0x262   :  { %v212_v47 = vpop.xlane.xlu0 %211 }
 0x263   :  { %v213_v48 = vsub.f32 %v206_v44, %v212_v47 }
 0x265   :  { %v214_v49 = vmul.f32 1.442695, %v213_v48 }
 0x267   :  { %343 = vpow2.f32 %v214_v49 }
 0x271   :  { %v344_v50 = vpop.eup %343 }
 0x272   :  { %v216_v51 = vsel %vm209_vm3, %v344_v50, 0.0 }
 0x273   :  { %217 = vadd.xlane.f32.xlu0 %v216_v51 }
 0x300   :  { %v218_v52 = vpop.xlane.xlu0 %217 }
 0x301   :  { %345 = vlog2.f32 %v218_v52 }
 0x30b   :  { %v346_v53 = vpop.eup %345 }
 0x30c   :  { %v220_v54 = vmul.f32 0.6931472, %v346_v53 }
 0x30e   :  { %v221_v55 = vadd.f32 %v220_v54, %v212_v47 }
 0x310   :  { %v222_v56 = vsub.f32 %v206_v44, %v221_v55 }
 0x312   :  { %223 = vst.msk [vmem:[#allocation2] sm:$0x3] %vm209_vm3, %v222_v56 }
 0x313   :  { %358 = shalt.err (!%p355_p4)
}
 0x314   :  { %s359_s20 = scalar_lea.hbm %s503_s6, 32 }
 0x315   :  { %p360_p5 = scmp.ne.s32.totalorder %s503_s6, %s359_s20  ;;  %p363_p6 = scmp.lt.u32.totalorder %s359_s20, %s503_s6 }
 0x317   :  { %p365_p7 = pnand %p363_p6, %p360_p5 }
 0x319   :  { %368 = shalt.err (!%p365_p7)
}
 0x31a   :  { %233 = dma.vmem_to_hbm [thread:$0]  %s231_s3, 32, %s503_s6, [#allocation3]  }
 0x31b   :  { %369 = dma.done.wait [#allocation3], 32  }
 0x31c   :  { %370 = vsyncadd [#allocation3], 4294967264 }
 0x31d   :  { %237 = vsyncpa [#allocation3], 1 }

</bundles_post_ra>
